<compile_context>
chip_gen: v6e
topology: v6e:2x2x1
jax: 0.10.0
libtpu: 0.0.40
codegen_flags: <defaults>
</compile_context>

<pallas_src>
import functools

import numpy as np
import jax
import jax.numpy as jnp
from jax.experimental import pallas as pl
from jax.experimental.pallas import tpu as pltpu


def _multi_wisard_kernel(hv_ref, nh_ref, x_ref, neg_ref, off_ref, out_ref, *,
                         n_entries, n_hashes_max, n_hashes_min,
                         filter_inputs_max):
    """One WiSARD discriminator bank per grid step (grid axis = sub-model).

    hv_ref  : (M, H_max*I_max) int32  SMEM  -- H3 hash values (scalar prefetch)
    nh_ref  : (M,)             int32  SMEM  -- real hash count per model
    x_ref   : (1, I_max, F_max, B) int32    -- permuted input bits in {0,1}
    neg_ref : (1, F_max, E_max, C) bf16     -- pre-binarized table (1.0 iff entry < 0)
    off_ref : (1, 1, C)        float32      -- per-model (n_filters + bias)
    out_ref : (1, B, C)        float32      -- final activations
    """
    E, H_max, I_max = n_entries, n_hashes_max, filter_inputs_max
    m = pl.program_id(0)
    nh = nh_ref[m]

    bits = x_ref[0]            # (I_max, F_max, B) int32 bits in {0,1}

    # Minimal entry-id iota; the == compare broadcasts it to (F, B, E).
    ent = jax.lax.broadcasted_iota(jnp.int32, (1, 1, E), 2)

    # --- H3 hash + one-hot UNION over hash functions (boolean OR chain) -----
    union = None
    for h in range(H_max):
        # idx[f, b] = XOR_i (bits[i, f, b] ? hv[h, i] : 0)  -- log-depth XOR tree
        terms = [bits[i] * hv_ref[m, h * I_max + i] for i in range(I_max)]
        while len(terms) > 1:
            nxt = [jnp.bitwise_xor(a, b) for a, b in zip(terms[0::2], terms[1::2])]
            if len(terms) % 2:
                nxt.append(terms[-1])
            terms = nxt
        idx_h = terms[0]                                     # (F, B)
        hit = idx_h[:, :, None] == ent                       # (F, B, E) bool
        if h >= n_hashes_min:                                # only mask padded hashes
            hit = jnp.logical_and(hit, h < nh)
        union = hit if union is None else jnp.logical_or(union, hit)

    oh = union.astype(jnp.bfloat16)                          # MXU lhs (F, B, E)

    # --- Bloom lookup: ONE batched bf16 MXU contraction over all filters ----
    #   (F, B, E) x (F, E, C) -> (F, B, C) = # distinct hashed entries that are < 0
    hits = jax.lax.dot_general(
        oh, neg_ref[0],
        dimension_numbers=(((2,), (1,)), ((0,), (0,))),
        preferred_element_type=jnp.float32)

    # Filter response after binarize + amin over hashes: +1 iff no hashed entry
    # is negative, else -1.  Padded filters have hits == 0 and contribute 0
    # because off already equals the real filter count (+ bias).
    any_neg = (hits >= 0.5).astype(jnp.float32)              # (F, B, C)
    out_ref[0] = off_ref[0] - 2.0 * jnp.sum(any_neg, axis=0)  # (B, C)


def multi_wisard_forward(x_bits, model_params):
    """BackpropMultiWiSARD.forward -> (n_models, batch, classes)."""
    B = x_bits.shape[0]
    M = len(model_params)
    C = model_params[0]["classes"]
    F_max = max(p["n_filters"] for p in model_params)
    I_max = max(p["filter_inputs"] for p in model_params)
    E_max = max(p["n_entries"] for p in model_params)
    H_max = max(p["n_hashes"] for p in model_params)
    H_min = min(p["n_hashes"] for p in model_params)

    x_list, neg_list, hv_list, nh_list, off_list = [], [], [], [], []
    for p in model_params:
        F, I = p["n_filters"], p["filter_inputs"]
        E, H = p["n_entries"], p["n_hashes"]
        input_bits = F * I
        # glue: pad null bits, apply random input_order permutation, regroup
        padded = jnp.pad(x_bits.astype(jnp.int32),
                         ((0, 0), (0, input_bits - x_bits.shape[1])))
        mapped = padded[:, p["input_order"]]                       # (B, input_bits)
        x_k = jnp.transpose(mapped.reshape(B, F, I), (2, 1, 0))    # (I, F, B)
        x_list.append(jnp.pad(x_k, ((0, I_max - I), (0, F_max - F), (0, 0))))
        # pre-binarized, transposed RAM table (less DMA, no in-kernel compare)
        neg = (p["table"] < 0.0).astype(jnp.bfloat16)              # (C, F, E)
        neg_t = jnp.transpose(neg, (1, 2, 0))                      # (F, E, C)
        neg_list.append(jnp.pad(neg_t, ((0, F_max - F), (0, E_max - E), (0, 0))))
        hv_list.append(jnp.pad(p["hash_values"].astype(jnp.int32),
                               ((0, H_max - H), (0, I_max - I))))
        nh_list.append(H)
        # fused epilogue constant: sum of +1 per real filter, plus the bias
        off_list.append(p["bias"] + jnp.float32(F))                # (C,)

    x_all = jnp.stack(x_list)                                      # (M, I_max, F_max, B)
    neg_all = jnp.stack(neg_list)                                  # (M, F_max, E_max, C)
    hv_all = jnp.stack(hv_list).reshape(M, H_max * I_max)          # flat 2D for SMEM
    nh_all = jnp.asarray(nh_list, jnp.int32)
    off_all = jnp.stack(off_list).reshape(M, 1, C)                 # (M, 1, C)

    kernel = functools.partial(_multi_wisard_kernel, n_entries=E_max,
                               n_hashes_max=H_max, n_hashes_min=H_min,
                               filter_inputs_max=I_max)

    grid_spec = pltpu.PrefetchScalarGridSpec(
        num_scalar_prefetch=2,            # hash values + per-model hash count -> SMEM
        grid=(M,),                        # one grid step per sub-model
        in_specs=[
            pl.BlockSpec((1, I_max, F_max, B), lambda m, hv, nh: (m, 0, 0, 0)),
            pl.BlockSpec((1, F_max, E_max, C), lambda m, hv, nh: (m, 0, 0, 0)),
            pl.BlockSpec((1, 1, C), lambda m, hv, nh: (m, 0, 0)),
        ],
        out_specs=pl.BlockSpec((1, B, C), lambda m, hv, nh: (m, 0, 0)),
    )

    return pl.pallas_call(
        kernel,
        out_shape=jax.ShapeDtypeStruct((M, B, C), jnp.float32),
        grid_spec=grid_spec,
        compiler_params=pltpu.CompilerParams(
            dimension_semantics=("parallel",)),     # shards models across TCs on v7x
    )(hv_all, nh_all, x_all, neg_all, off_all)


# ---------------------------------------------------------------------------
# Deterministic parameter initialization (mirrors BackpropWiSARD.__init__)
# ---------------------------------------------------------------------------
def init_wisard_params(key, inputs, classes, filter_inputs, filter_entries,
                       filter_hash_functions):
    assert float(np.log2(filter_entries)).is_integer()
    input_bits = int(np.ceil(inputs / filter_inputs)) * filter_inputs
    n_filters = input_bits // filter_inputs
    k_tab, k_hash, k_ord = jax.random.split(key, 3)
    table = jax.random.uniform(k_tab, (classes, n_filters, filter_entries),
                               jnp.float32, -1.0, 1.0)          # nn.init.uniform_(-1, 1)
    hash_values = jax.random.randint(
        k_hash, (filter_hash_functions, filter_inputs), 0, filter_entries,
        jnp.int32)                                              # generate_h3_values
    input_order = jax.random.permutation(k_ord, input_bits).astype(jnp.int32)
    bias = jnp.zeros((classes,), jnp.float32)
    return dict(table=table, hash_values=hash_values, input_order=input_order,
                bias=bias, n_filters=n_filters, filter_inputs=filter_inputs,
                n_entries=filter_entries, n_hashes=filter_hash_functions,
                classes=classes)


# ---------------------------------------------------------------------------
# Pure-JAX reference (gather-based), used only to verify the kernel
# ---------------------------------------------------------------------------
def wisard_reference(x_bits, params):
    B = x_bits.shape[0]
    F, I = params["n_filters"], params["filter_inputs"]
    E, H, C = params["n_entries"], params["n_hashes"], params["classes"]
    input_bits = F * I
    padded = jnp.pad(x_bits.astype(jnp.int32),
                     ((0, 0), (0, input_bits - x_bits.shape[1])))
    mapped = padded[:, params["input_order"]].reshape(B, F, I)
    contrib = mapped[:, :, None, :] * params["hash_values"][None, None, :, :]
    idx = functools.reduce(jnp.bitwise_xor,
                           [contrib[..., i] for i in range(I)])       # (B, F, H)
    table_b = jnp.broadcast_to(params["table"][None], (B, C, F, E))
    idx_b = jnp.broadcast_to(idx[:, None], (B, C, F, H))
    lookup = jnp.take_along_axis(table_b, idx_b, axis=3)               # (B, C, F, H)
    bin_lookup = (lookup >= 0).astype(jnp.float32) * 2.0 - 1.0
    reduced = bin_lookup.min(axis=-1)                                  # (B, C, F)
    return reduced.sum(axis=2) + params["bias"][None, :]


if __name__ == "__main__":
    INPUTS, CLASSES, BATCH = 60, 10, 8
    # (filter_inputs, filter_entries, filter_hash_functions) per sub-model
    CONFIGS = [(8, 128, 2), (6, 64, 3)]
    ENCODING_BITS = 2  # stored by BackpropMultiWiSARD, unused in forward

    root = jax.random.PRNGKey(0)
    k_x, k_p = jax.random.split(root)
    x_b = jax.random.bernoulli(k_x, 0.5, (BATCH, INPUTS)).astype(jnp.int32)

    model_params = [
        init_wisard_params(jax.random.fold_in(k_p, i), INPUTS, CLASSES, *cfg)
        for i, cfg in enumerate(CONFIGS)
    ]

    out = jax.block_until_ready(multi_wisard_forward(x_b, model_params))
    assert out.shape == (len(CONFIGS), BATCH, CLASSES), out.shape

    ref = jnp.stack([wisard_reference(x_b, p) for p in model_params])
    np.testing.assert_allclose(np.asarray(out), np.asarray(ref), atol=1e-5)

    print("KERNEL_OK")
</pallas_src>

<mosaic_0001>
module attributes {stable_mosaic.version = 11 : i64} {
  func.func @_multi_wisard_kernel(%arg0: i32, %arg1: memref<2x24xi32, #tpu.memory_space<smem>>, %arg2: memref<2xi32, #tpu.memory_space<smem>>, %arg3: memref<1x8x10x8xi32, #tpu.memory_space<vmem>>, %arg4: memref<1x10x128x10xbf16, #tpu.memory_space<vmem>>, %arg5: memref<1x1x10xf32, #tpu.memory_space<vmem>>, %arg6: memref<1x8x10xf32, #tpu.memory_space<vmem>>) attributes {dimension_semantics = [#tpu.dimension_semantics<parallel>], iteration_bounds = array<i64: 2>, scalar_prefetch = 2 : i64, scratch_operands = 0 : i64, tpu.core_type = #tpu.core_type<tc>, window_params = [{transform_indices = @transform_0, window_bounds = array<i64: 1, 8, 10, 8>}, {transform_indices = @transform_1, window_bounds = array<i64: 1, 10, 128, 10>}, {transform_indices = @transform_2, window_bounds = array<i64: 1, 1, 10>}, {transform_indices = @transform_3, window_bounds = array<i64: 1, 8, 10>}]} {
    %0 = arith.index_cast %arg0 : i32 to index
    %1 = memref.load %arg2[%0] : memref<2xi32, #tpu.memory_space<smem>>
    %c0 = arith.constant 0 : index
    %c0_0 = arith.constant 0 : index
    %c0_1 = arith.constant 0 : index
    %c0_2 = arith.constant 0 : index
    %2 = vector.load %arg3[%c0, %c0_0, %c0_1, %c0_2] : memref<1x8x10x8xi32, #tpu.memory_space<vmem>>, vector<1x8x10x8xi32>
    %3 = vector.shape_cast %2 : vector<1x8x10x8xi32> to vector<8x10x8xi32>
    %4 = tpu.iota {dimensions = array<i32: 2>} : vector<1x1x128xi32>
    %5 = vector.extract_strided_slice %3 {offsets = [0, 0, 0], sizes = [1, 10, 8], strides = [1, 1, 1]} : vector<8x10x8xi32> to vector<1x10x8xi32>
    %6 = vector.shape_cast %5 : vector<1x10x8xi32> to vector<10x8xi32>
    %7 = arith.index_cast %arg0 : i32 to index
    %c0_3 = arith.constant 0 : index
    %8 = memref.load %arg1[%7, %c0_3] : memref<2x24xi32, #tpu.memory_space<smem>>
    %9 = vector.broadcast %8 : i32 to vector<10x8xi32>
    %10 = arith.muli %6, %9 : vector<10x8xi32>
    %11 = vector.extract_strided_slice %3 {offsets = [1, 0, 0], sizes = [1, 10, 8], strides = [1, 1, 1]} : vector<8x10x8xi32> to vector<1x10x8xi32>
    %12 = vector.shape_cast %11 : vector<1x10x8xi32> to vector<10x8xi32>
    %13 = arith.index_cast %arg0 : i32 to index
    %c1 = arith.constant 1 : index
    %14 = memref.load %arg1[%13, %c1] : memref<2x24xi32, #tpu.memory_space<smem>>
    %15 = vector.broadcast %14 : i32 to vector<10x8xi32>
    %16 = arith.muli %12, %15 : vector<10x8xi32>
    %17 = vector.extract_strided_slice %3 {offsets = [2, 0, 0], sizes = [1, 10, 8], strides = [1, 1, 1]} : vector<8x10x8xi32> to vector<1x10x8xi32>
    %18 = vector.shape_cast %17 : vector<1x10x8xi32> to vector<10x8xi32>
    %19 = arith.index_cast %arg0 : i32 to index
    %c2 = arith.constant 2 : index
    %20 = memref.load %arg1[%19, %c2] : memref<2x24xi32, #tpu.memory_space<smem>>
    %21 = vector.broadcast %20 : i32 to vector<10x8xi32>
    %22 = arith.muli %18, %21 : vector<10x8xi32>
    %23 = vector.extract_strided_slice %3 {offsets = [3, 0, 0], sizes = [1, 10, 8], strides = [1, 1, 1]} : vector<8x10x8xi32> to vector<1x10x8xi32>
    %24 = vector.shape_cast %23 : vector<1x10x8xi32> to vector<10x8xi32>
    %25 = arith.index_cast %arg0 : i32 to index
    %c3 = arith.constant 3 : index
    %26 = memref.load %arg1[%25, %c3] : memref<2x24xi32, #tpu.memory_space<smem>>
    %27 = vector.broadcast %26 : i32 to vector<10x8xi32>
    %28 = arith.muli %24, %27 : vector<10x8xi32>
    %29 = vector.extract_strided_slice %3 {offsets = [4, 0, 0], sizes = [1, 10, 8], strides = [1, 1, 1]} : vector<8x10x8xi32> to vector<1x10x8xi32>
    %30 = vector.shape_cast %29 : vector<1x10x8xi32> to vector<10x8xi32>
    %31 = arith.index_cast %arg0 : i32 to index
    %c4 = arith.constant 4 : index
    %32 = memref.load %arg1[%31, %c4] : memref<2x24xi32, #tpu.memory_space<smem>>
    %33 = vector.broadcast %32 : i32 to vector<10x8xi32>
    %34 = arith.muli %30, %33 : vector<10x8xi32>
    %35 = vector.extract_strided_slice %3 {offsets = [5, 0, 0], sizes = [1, 10, 8], strides = [1, 1, 1]} : vector<8x10x8xi32> to vector<1x10x8xi32>
    %36 = vector.shape_cast %35 : vector<1x10x8xi32> to vector<10x8xi32>
    %37 = arith.index_cast %arg0 : i32 to index
    %c5 = arith.constant 5 : index
    %38 = memref.load %arg1[%37, %c5] : memref<2x24xi32, #tpu.memory_space<smem>>
    %39 = vector.broadcast %38 : i32 to vector<10x8xi32>
    %40 = arith.muli %36, %39 : vector<10x8xi32>
    %41 = vector.extract_strided_slice %3 {offsets = [6, 0, 0], sizes = [1, 10, 8], strides = [1, 1, 1]} : vector<8x10x8xi32> to vector<1x10x8xi32>
    %42 = vector.shape_cast %41 : vector<1x10x8xi32> to vector<10x8xi32>
    %43 = arith.index_cast %arg0 : i32 to index
    %c6 = arith.constant 6 : index
    %44 = memref.load %arg1[%43, %c6] : memref<2x24xi32, #tpu.memory_space<smem>>
    %45 = vector.broadcast %44 : i32 to vector<10x8xi32>
    %46 = arith.muli %42, %45 : vector<10x8xi32>
    %47 = vector.extract_strided_slice %3 {offsets = [7, 0, 0], sizes = [1, 10, 8], strides = [1, 1, 1]} : vector<8x10x8xi32> to vector<1x10x8xi32>
    %48 = vector.shape_cast %47 : vector<1x10x8xi32> to vector<10x8xi32>
    %49 = arith.index_cast %arg0 : i32 to index
    %c7 = arith.constant 7 : index
    %50 = memref.load %arg1[%49, %c7] : memref<2x24xi32, #tpu.memory_space<smem>>
    %51 = vector.broadcast %50 : i32 to vector<10x8xi32>
    %52 = arith.muli %48, %51 : vector<10x8xi32>
    %53 = arith.xori %10, %16 : vector<10x8xi32>
    %54 = arith.xori %22, %28 : vector<10x8xi32>
    %55 = arith.xori %34, %40 : vector<10x8xi32>
    %56 = arith.xori %46, %52 : vector<10x8xi32>
    %57 = arith.xori %53, %54 : vector<10x8xi32>
    %58 = arith.xori %55, %56 : vector<10x8xi32>
    %59 = arith.xori %57, %58 : vector<10x8xi32>
    %60 = vector.shape_cast %59 : vector<10x8xi32> to vector<10x8x1xi32>
    %61 = vector.broadcast %60 : vector<10x8x1xi32> to vector<10x8x128xi32>
    %62 = vector.broadcast %4 : vector<1x1x128xi32> to vector<10x8x128xi32>
    %63 = arith.cmpi eq, %61, %62 : vector<10x8x128xi32>
    %64 = vector.extract_strided_slice %3 {offsets = [0, 0, 0], sizes = [1, 10, 8], strides = [1, 1, 1]} : vector<8x10x8xi32> to vector<1x10x8xi32>
    %65 = vector.shape_cast %64 : vector<1x10x8xi32> to vector<10x8xi32>
    %66 = arith.index_cast %arg0 : i32 to index
    %c8 = arith.constant 8 : index
    %67 = memref.load %arg1[%66, %c8] : memref<2x24xi32, #tpu.memory_space<smem>>
    %68 = vector.broadcast %67 : i32 to vector<10x8xi32>
    %69 = arith.muli %65, %68 : vector<10x8xi32>
    %70 = vector.extract_strided_slice %3 {offsets = [1, 0, 0], sizes = [1, 10, 8], strides = [1, 1, 1]} : vector<8x10x8xi32> to vector<1x10x8xi32>
    %71 = vector.shape_cast %70 : vector<1x10x8xi32> to vector<10x8xi32>
    %72 = arith.index_cast %arg0 : i32 to index
    %c9 = arith.constant 9 : index
    %73 = memref.load %arg1[%72, %c9] : memref<2x24xi32, #tpu.memory_space<smem>>
    %74 = vector.broadcast %73 : i32 to vector<10x8xi32>
    %75 = arith.muli %71, %74 : vector<10x8xi32>
    %76 = vector.extract_strided_slice %3 {offsets = [2, 0, 0], sizes = [1, 10, 8], strides = [1, 1, 1]} : vector<8x10x8xi32> to vector<1x10x8xi32>
    %77 = vector.shape_cast %76 : vector<1x10x8xi32> to vector<10x8xi32>
    %78 = arith.index_cast %arg0 : i32 to index
    %c10 = arith.constant 10 : index
    %79 = memref.load %arg1[%78, %c10] : memref<2x24xi32, #tpu.memory_space<smem>>
    %80 = vector.broadcast %79 : i32 to vector<10x8xi32>
    %81 = arith.muli %77, %80 : vector<10x8xi32>
    %82 = vector.extract_strided_slice %3 {offsets = [3, 0, 0], sizes = [1, 10, 8], strides = [1, 1, 1]} : vector<8x10x8xi32> to vector<1x10x8xi32>
    %83 = vector.shape_cast %82 : vector<1x10x8xi32> to vector<10x8xi32>
    %84 = arith.index_cast %arg0 : i32 to index
    %c11 = arith.constant 11 : index
    %85 = memref.load %arg1[%84, %c11] : memref<2x24xi32, #tpu.memory_space<smem>>
    %86 = vector.broadcast %85 : i32 to vector<10x8xi32>
    %87 = arith.muli %83, %86 : vector<10x8xi32>
    %88 = vector.extract_strided_slice %3 {offsets = [4, 0, 0], sizes = [1, 10, 8], strides = [1, 1, 1]} : vector<8x10x8xi32> to vector<1x10x8xi32>
    %89 = vector.shape_cast %88 : vector<1x10x8xi32> to vector<10x8xi32>
    %90 = arith.index_cast %arg0 : i32 to index
    %c12 = arith.constant 12 : index
    %91 = memref.load %arg1[%90, %c12] : memref<2x24xi32, #tpu.memory_space<smem>>
    %92 = vector.broadcast %91 : i32 to vector<10x8xi32>
    %93 = arith.muli %89, %92 : vector<10x8xi32>
    %94 = vector.extract_strided_slice %3 {offsets = [5, 0, 0], sizes = [1, 10, 8], strides = [1, 1, 1]} : vector<8x10x8xi32> to vector<1x10x8xi32>
    %95 = vector.shape_cast %94 : vector<1x10x8xi32> to vector<10x8xi32>
    %96 = arith.index_cast %arg0 : i32 to index
    %c13 = arith.constant 13 : index
    %97 = memref.load %arg1[%96, %c13] : memref<2x24xi32, #tpu.memory_space<smem>>
    %98 = vector.broadcast %97 : i32 to vector<10x8xi32>
    %99 = arith.muli %95, %98 : vector<10x8xi32>
    %100 = vector.extract_strided_slice %3 {offsets = [6, 0, 0], sizes = [1, 10, 8], strides = [1, 1, 1]} : vector<8x10x8xi32> to vector<1x10x8xi32>
    %101 = vector.shape_cast %100 : vector<1x10x8xi32> to vector<10x8xi32>
    %102 = arith.index_cast %arg0 : i32 to index
    %c14 = arith.constant 14 : index
    %103 = memref.load %arg1[%102, %c14] : memref<2x24xi32, #tpu.memory_space<smem>>
    %104 = vector.broadcast %103 : i32 to vector<10x8xi32>
    %105 = arith.muli %101, %104 : vector<10x8xi32>
    %106 = vector.extract_strided_slice %3 {offsets = [7, 0, 0], sizes = [1, 10, 8], strides = [1, 1, 1]} : vector<8x10x8xi32> to vector<1x10x8xi32>
    %107 = vector.shape_cast %106 : vector<1x10x8xi32> to vector<10x8xi32>
    %108 = arith.index_cast %arg0 : i32 to index
    %c15 = arith.constant 15 : index
    %109 = memref.load %arg1[%108, %c15] : memref<2x24xi32, #tpu.memory_space<smem>>
    %110 = vector.broadcast %109 : i32 to vector<10x8xi32>
    %111 = arith.muli %107, %110 : vector<10x8xi32>
    %112 = arith.xori %69, %75 : vector<10x8xi32>
    %113 = arith.xori %81, %87 : vector<10x8xi32>
    %114 = arith.xori %93, %99 : vector<10x8xi32>
    %115 = arith.xori %105, %111 : vector<10x8xi32>
    %116 = arith.xori %112, %113 : vector<10x8xi32>
    %117 = arith.xori %114, %115 : vector<10x8xi32>
    %118 = arith.xori %116, %117 : vector<10x8xi32>
    %119 = vector.shape_cast %118 : vector<10x8xi32> to vector<10x8x1xi32>
    %120 = vector.broadcast %119 : vector<10x8x1xi32> to vector<10x8x128xi32>
    %121 = vector.broadcast %4 : vector<1x1x128xi32> to vector<10x8x128xi32>
    %122 = arith.cmpi eq, %120, %121 : vector<10x8x128xi32>
    %123 = arith.ori %63, %122 : vector<10x8x128xi1>
    %124 = vector.extract_strided_slice %3 {offsets = [0, 0, 0], sizes = [1, 10, 8], strides = [1, 1, 1]} : vector<8x10x8xi32> to vector<1x10x8xi32>
    %125 = vector.shape_cast %124 : vector<1x10x8xi32> to vector<10x8xi32>
    %126 = arith.index_cast %arg0 : i32 to index
    %c16 = arith.constant 16 : index
    %127 = memref.load %arg1[%126, %c16] : memref<2x24xi32, #tpu.memory_space<smem>>
    %128 = vector.broadcast %127 : i32 to vector<10x8xi32>
    %129 = arith.muli %125, %128 : vector<10x8xi32>
    %130 = vector.extract_strided_slice %3 {offsets = [1, 0, 0], sizes = [1, 10, 8], strides = [1, 1, 1]} : vector<8x10x8xi32> to vector<1x10x8xi32>
    %131 = vector.shape_cast %130 : vector<1x10x8xi32> to vector<10x8xi32>
    %132 = arith.index_cast %arg0 : i32 to index
    %c17 = arith.constant 17 : index
    %133 = memref.load %arg1[%132, %c17] : memref<2x24xi32, #tpu.memory_space<smem>>
    %134 = vector.broadcast %133 : i32 to vector<10x8xi32>
    %135 = arith.muli %131, %134 : vector<10x8xi32>
    %136 = vector.extract_strided_slice %3 {offsets = [2, 0, 0], sizes = [1, 10, 8], strides = [1, 1, 1]} : vector<8x10x8xi32> to vector<1x10x8xi32>
    %137 = vector.shape_cast %136 : vector<1x10x8xi32> to vector<10x8xi32>
    %138 = arith.index_cast %arg0 : i32 to index
    %c18 = arith.constant 18 : index
    %139 = memref.load %arg1[%138, %c18] : memref<2x24xi32, #tpu.memory_space<smem>>
    %140 = vector.broadcast %139 : i32 to vector<10x8xi32>
    %141 = arith.muli %137, %140 : vector<10x8xi32>
    %142 = vector.extract_strided_slice %3 {offsets = [3, 0, 0], sizes = [1, 10, 8], strides = [1, 1, 1]} : vector<8x10x8xi32> to vector<1x10x8xi32>
    %143 = vector.shape_cast %142 : vector<1x10x8xi32> to vector<10x8xi32>
    %144 = arith.index_cast %arg0 : i32 to index
    %c19 = arith.constant 19 : index
    %145 = memref.load %arg1[%144, %c19] : memref<2x24xi32, #tpu.memory_space<smem>>
    %146 = vector.broadcast %145 : i32 to vector<10x8xi32>
    %147 = arith.muli %143, %146 : vector<10x8xi32>
    %148 = vector.extract_strided_slice %3 {offsets = [4, 0, 0], sizes = [1, 10, 8], strides = [1, 1, 1]} : vector<8x10x8xi32> to vector<1x10x8xi32>
    %149 = vector.shape_cast %148 : vector<1x10x8xi32> to vector<10x8xi32>
    %150 = arith.index_cast %arg0 : i32 to index
    %c20 = arith.constant 20 : index
    %151 = memref.load %arg1[%150, %c20] : memref<2x24xi32, #tpu.memory_space<smem>>
    %152 = vector.broadcast %151 : i32 to vector<10x8xi32>
    %153 = arith.muli %149, %152 : vector<10x8xi32>
    %154 = vector.extract_strided_slice %3 {offsets = [5, 0, 0], sizes = [1, 10, 8], strides = [1, 1, 1]} : vector<8x10x8xi32> to vector<1x10x8xi32>
    %155 = vector.shape_cast %154 : vector<1x10x8xi32> to vector<10x8xi32>
    %156 = arith.index_cast %arg0 : i32 to index
    %c21 = arith.constant 21 : index
    %157 = memref.load %arg1[%156, %c21] : memref<2x24xi32, #tpu.memory_space<smem>>
    %158 = vector.broadcast %157 : i32 to vector<10x8xi32>
    %159 = arith.muli %155, %158 : vector<10x8xi32>
    %160 = vector.extract_strided_slice %3 {offsets = [6, 0, 0], sizes = [1, 10, 8], strides = [1, 1, 1]} : vector<8x10x8xi32> to vector<1x10x8xi32>
    %161 = vector.shape_cast %160 : vector<1x10x8xi32> to vector<10x8xi32>
    %162 = arith.index_cast %arg0 : i32 to index
    %c22 = arith.constant 22 : index
    %163 = memref.load %arg1[%162, %c22] : memref<2x24xi32, #tpu.memory_space<smem>>
    %164 = vector.broadcast %163 : i32 to vector<10x8xi32>
    %165 = arith.muli %161, %164 : vector<10x8xi32>
    %166 = vector.extract_strided_slice %3 {offsets = [7, 0, 0], sizes = [1, 10, 8], strides = [1, 1, 1]} : vector<8x10x8xi32> to vector<1x10x8xi32>
    %167 = vector.shape_cast %166 : vector<1x10x8xi32> to vector<10x8xi32>
    %168 = arith.index_cast %arg0 : i32 to index
    %c23 = arith.constant 23 : index
    %169 = memref.load %arg1[%168, %c23] : memref<2x24xi32, #tpu.memory_space<smem>>
    %170 = vector.broadcast %169 : i32 to vector<10x8xi32>
    %171 = arith.muli %167, %170 : vector<10x8xi32>
    %172 = arith.xori %129, %135 : vector<10x8xi32>
    %173 = arith.xori %141, %147 : vector<10x8xi32>
    %174 = arith.xori %153, %159 : vector<10x8xi32>
    %175 = arith.xori %165, %171 : vector<10x8xi32>
    %176 = arith.xori %172, %173 : vector<10x8xi32>
    %177 = arith.xori %174, %175 : vector<10x8xi32>
    %178 = arith.xori %176, %177 : vector<10x8xi32>
    %179 = vector.shape_cast %178 : vector<10x8xi32> to vector<10x8x1xi32>
    %180 = vector.broadcast %179 : vector<10x8x1xi32> to vector<10x8x128xi32>
    %181 = vector.broadcast %4 : vector<1x1x128xi32> to vector<10x8x128xi32>
    %182 = arith.cmpi eq, %180, %181 : vector<10x8x128xi32>
    %c2_i32 = arith.constant 2 : i32
    %183 = arith.cmpi sgt, %1, %c2_i32 : i32
    %184 = vector.broadcast %183 : i1 to vector<10x8x128xi1>
    %185 = arith.andi %182, %184 : vector<10x8x128xi1>
    %186 = arith.ori %123, %185 : vector<10x8x128xi1>
    %187 = arith.extui %186 : vector<10x8x128xi1> to vector<10x8x128xi32>
    %188 = arith.sitofp %187 : vector<10x8x128xi32> to vector<10x8x128xf32>
    %189 = arith.truncf %188 : vector<10x8x128xf32> to vector<10x8x128xbf16>
    %c0_4 = arith.constant 0 : index
    %c0_5 = arith.constant 0 : index
    %c0_6 = arith.constant 0 : index
    %c0_7 = arith.constant 0 : index
    %190 = vector.load %arg4[%c0_4, %c0_5, %c0_6, %c0_7] : memref<1x10x128x10xbf16, #tpu.memory_space<vmem>>, vector<1x10x128x10xbf16>
    %191 = vector.shape_cast %190 : vector<1x10x128x10xbf16> to vector<10x128x10xbf16>
    %cst = arith.constant dense<0.000000e+00> : vector<10x8x10xf32>
    %192 = tpu.matmul %189, %191, %cst {dimension_numbers = #tpu.dot_dimension_numbers<[2], [1], [1], [2], [0, 0, 0, 1, 1, 2], [0], [0]>} : vector<10x8x128xbf16>, vector<10x128x10xbf16>, vector<10x8x10xf32> -> vector<10x8x10xf32>
    %cst_8 = arith.constant 5.000000e-01 : f32
    %193 = vector.broadcast %cst_8 : f32 to vector<10x8x10xf32>
    %194 = arith.cmpf oge, %192, %193 : vector<10x8x10xf32>
    %195 = arith.extui %194 : vector<10x8x10xi1> to vector<10x8x10xi32>
    %196 = arith.sitofp %195 : vector<10x8x10xi32> to vector<10x8x10xf32>
    %c0_9 = arith.constant 0 : index
    %c0_10 = arith.constant 0 : index
    %c0_11 = arith.constant 0 : index
    %197 = vector.load %arg5[%c0_9, %c0_10, %c0_11] : memref<1x1x10xf32, #tpu.memory_space<vmem>>, vector<1x1x10xf32>
    %198 = vector.shape_cast %197 : vector<1x1x10xf32> to vector<1x10xf32>
    %cst_12 = arith.constant dense<0.000000e+00> : vector<8x10xf32>
    %199 = vector.multi_reduction <add>, %196, %cst_12 [0] : vector<10x8x10xf32> to vector<8x10xf32>
    %cst_13 = arith.constant 2.000000e+00 : f32
    %200 = vector.broadcast %cst_13 : f32 to vector<8x10xf32>
    %201 = arith.mulf %200, %199 : vector<8x10xf32>
    %202 = vector.broadcast %198 : vector<1x10xf32> to vector<8x10xf32>
    %203 = arith.subf %202, %201 : vector<8x10xf32>
    %c0_14 = arith.constant 0 : index
    %c0_15 = arith.constant 0 : index
    %c0_16 = arith.constant 0 : index
    %204 = vector.load %arg6[%c0_14, %c0_15, %c0_16] : memref<1x8x10xf32, #tpu.memory_space<vmem>>, vector<1x8x10xf32>
    %205 = vector.shape_cast %204 : vector<1x8x10xf32> to vector<8x10xf32>
    %206 = vector.shape_cast %203 : vector<8x10xf32> to vector<1x8x10xf32>
    tpu.vector_store %arg6[%c0_14, %c0_15, %c0_16], %206 {strides = array<i32>} : memref<1x8x10xf32, #tpu.memory_space<vmem>>, vector<1x8x10xf32>,
    return
  }
  func.func @transform_0(%arg0: i32, %arg1: memref<2x24xi32, #tpu.memory_space<smem>>, %arg2: memref<2xi32, #tpu.memory_space<smem>>) -> (i32, i32, i32, i32) {
    %c0_i32 = arith.constant 0 : i32
    %c0_i32_0 = arith.constant 0 : i32
    %c0_i32_1 = arith.constant 0 : i32
    %c0_i32_2 = arith.constant 0 : i32
    return %arg0, %c0_i32, %c0_i32_0, %c0_i32_1 : i32, i32, i32, i32
  }
  func.func @transform_1(%arg0: i32, %arg1: memref<2x24xi32, #tpu.memory_space<smem>>, %arg2: memref<2xi32, #tpu.memory_space<smem>>) -> (i32, i32, i32, i32) {
    %c0_i32 = arith.constant 0 : i32
    %c0_i32_0 = arith.constant 0 : i32
    %c0_i32_1 = arith.constant 0 : i32
    %c0_i32_2 = arith.constant 0 : i32
    return %arg0, %c0_i32, %c0_i32_0, %c0_i32_1 : i32, i32, i32, i32
  }
  func.func @transform_2(%arg0: i32, %arg1: memref<2x24xi32, #tpu.memory_space<smem>>, %arg2: memref<2xi32, #tpu.memory_space<smem>>) -> (i32, i32, i32) {
    %c0_i32 = arith.constant 0 : i32
    %c0_i32_0 = arith.constant 0 : i32
    %c0_i32_1 = arith.constant 0 : i32
    return %arg0, %c0_i32, %c0_i32_0 : i32, i32, i32
  }
  func.func @transform_3(%arg0: i32, %arg1: memref<2x24xi32, #tpu.memory_space<smem>>, %arg2: memref<2xi32, #tpu.memory_space<smem>>) -> (i32, i32, i32) {
    %c0_i32 = arith.constant 0 : i32
    %c0_i32_0 = arith.constant 0 : i32
    %c0_i32_1 = arith.constant 0 : i32
    return %arg0, %c0_i32, %c0_i32_0 : i32, i32, i32
  }
}

</mosaic_0001>

<bundles_post_ra>
// kernel: tpu_custom_call.1
= control target key start
LH: loop header
LB: loop body
LE: loop exit
PB: predicated region body
PF: predicated region fallthrough
CT: control target
= control target key end

     0   :  { %s3354_s0 = inlined_call_operand.vmem [shape: s32[2,24], index: 0, kind: input, shape index: {}]   ;;  %s3355_s2 = inlined_call_operand.vmem [shape: s32[2,8,10,8], index: 2, kind: input, shape index: {}]   ;;  %s3356_s3 = inlined_call_operand.vmem [shape: bf16[2,10,128,10], index: 3, kind: input, shape index: {}]   ;;  %s3357_s4 = inlined_call_operand.vmem [shape: f32[2,1,10], index: 4, kind: input, shape index: {}]   ;;  %s3358_s5 = inlined_call_operand.hbm [shape: f32[2,8,10], index: 5, kind: output, shape index: {}]   ;;  %s3359_s1 = inlined_call_operand.vmem [shape: s32[2], index: 1, kind: input, shape index: {}]  }
   0x1   :  { %3370 = sst [smem:[#allocation17_spill]] %s3355_s2  ;;  %s10_s20 = sshll.u32 %s3354_s0, 4  ;;  %s11_s20 = int_to_ptr.vmem [resolvable:$true] %s10_s20 }
   0x2   :  { %3371 = sst [smem:[#allocation18_spill]] %s3356_s3  ;;  %s14_s23 = sshll.u32 %s3359_s1, 4  ;;  %s15_s23 = int_to_ptr.vmem [resolvable:$true] %s14_s23 }
   0x3   :  { %3372 = sst [smem:[#allocation19_spill]] %s3357_s4  ;;  %s2445_s24 = scalar_lea.vmem %s11_s20, 32 }
   0x4   :  { %3373 = sst [smem:[#allocation20_spill]] %s3358_s5  ;;  %p2446_p0 = scmp.ne.s32.totalorder %s11_s20, %s2445_s24 }
   0x5   :  { %p2450_p1 = scmp.lt.s32.totalorder %s11_s20, %s11_s20  ;;  %p2451_p2 = scmp.lt.s32.totalorder %s2445_s24, %s2445_s24 }
   0x7   :  { %p2452_p3 = por %p2451_p2, %p2450_p1 }
   0x9   :  { %p2453_p4 = pnand %p2452_p3, %p2446_p0 }
   0xb   :  { %2456 = shalt.err (!%p2453_p4)  }
   0xc   :  { %s2533_s25 = smov [#allocation3]   ;;  %s2457_s26 = scalar_lea.vmem %s15_s23, 16 }
   0xd   :  { %13 = dma.vmem_to_smem %s11_s20, 32, %s2533_s25, [#allocation2] }
   0xe   :  { %p2458_p5 = scmp.ne.s32.totalorder %s15_s23, %s2457_s26  ;;  %p2462_p6 = scmp.lt.s32.totalorder %s15_s23, %s15_s23 }
   0xf   :  { %p2463_p7 = scmp.lt.s32.totalorder %s2457_s26, %s2457_s26 }
  0x11   :  { %p2464_p8 = por %p2463_p7, %p2462_p6 }
  0x13   :  { %p2465_p9 = pnand %p2464_p8, %p2458_p5 }
  0x15   :  { %2468 = shalt.err (!%p2465_p9)  }
  0x16   :  { %s2534_s0 = smov [#allocation4]  }
  0x17   :  { %17 = dma.vmem_to_smem %s15_s23, 16, %s2534_s0, [#allocation2] }
  0x18   :  { %2511 = dma.done.wait [#allocation2], 48 }
  0x19   :  { %2512 = vsyncadd [#allocation2], 4294967248 }
  0x1a   :  { %19 = sfence }
  0x1b   :  { %20 = vsyncpa [#allocation6], 0 }
  0x1c   :  { %22 = vsyncpa [#allocation6 + $0x1], 0  ;;  %s2575_s1 = smov 0   ;;  %s2577_s27 = smov 0  }
  0x1d   :  { %s2579_s28 = smov 0   ;;  %s2581_s29 = smov 0  }
  0x1e LB: > { %3374 = sst [smem:[#allocation9_spill]] %s2519_s1  ;;  %s2596_s30 = sadd.s32 4294967295, %s2531_s29   ;;  %s2531_s29 = sphi %s2581_s29, %s3425_s29   ;;  %s2527_s28 = sphi %s2579_s28, %s3427_s28   ;;  %s2523_s27 = sphi %s2577_s27, %s3429_s27   ;;  %s2519_s1 = sphi %s2575_s1, %s3428_s1  }
  0x1f   : > { %3375 = sst [smem:[#allocation10_spill]] %s2527_s28  ;;  %s1895_s6 = sadd.s32 4294967294, %s2531_s29  }
  0x20   : > { %3376 = sst [smem:[#allocation11_spill]] %s2531_s29  ;;  %s2600_s7 = sadd.s32 1, %s2531_s29  }
  0x21   : > { %3377 = sst [smem:[#allocation12_spill]] %s2600_s7  ;;  %s113_s8 = sadd.s32 1, %s2527_s28 }
  0x22   : > { %s110_s9 = ssub.s32 %s2531_s29, %s2600_s7  ;;  %p123_p10 = scmp.ne.s32.totalorder %s2527_s28, %s2523_s27 }
  0x23   : > { %p111_p11 = scmp.eq.s32.totalorder %s110_s9, 0  ;;  %p124_p12 = scmp.eq.s32.totalorder %s2596_s30, 1 }
  0x24   : > { %p129_p13 = scmp.ne.s32.totalorder %s2523_s27, %s2519_s1  ;;  %p130_p0 = scmp.eq.s32.totalorder %s1895_s6, 1 }
  0x25   : > { %s2611_s10 = scalar_select %p111_p11, %s2527_s28, %s113_s8  }
  0x26   : > { %p2613_p1 = por %p124_p12, %p123_p10  ;;  %p2617_p2 = por %p130_p0, %p129_p13 }
  0x27   : > { %3378 = sst [smem:[#allocation13_spill]] %s2611_s10  ;;  %p1898_p3 = scmp.ge.s32.totalorder %s2531_s29, 1 }
  0x28   : > { %s3379_s11 = scalar_select %p2613_p1, 1, 0 }
  0x29   : > { %s3381_s12 = scalar_select %p2617_p2, 1, 0 }
  0x2a   : > { %3380 = sst [smem:[#allocation14_spill]] %s3379_s11  ;;  %p170_p4 = scmp.lt.s32.totalorder %s2531_s29, 3 }
  0x2b   : > { %3382 = sst [smem:[#allocation15_spill]] %s3381_s12 }
  0x2c   : > { %p171_p5 = pnand %p1898_p3, %p170_p4 }
  0x2e   : > { %174 = sbr.rel (%p171_p5) target bundleno = 564 (0x234), region = 32 }
  0x33   : > { %p202_p6 = scmp.lt.s32.totalorder %s2596_s30, 1  ;;  %s2625_s13 = sshll.u32 %s2596_s30, 7  ;;  %v2535_v0 = vmov 0.0   ;;  %v233_v1 = vlaneseq  ;;  %vm2536_vm0 = vmmov 0  }
  0x34   : > { %s513_s14 = sadd.s32 16, %s2625_s13  ;;  %s518_s15 = sadd.s32 17, %s2625_s13  ;;  %2120 = vmatprep.subr.bf16.mxu0 %v2535_v0  ;;  %2140 = vmatprep.subr.bf16.mxu1 %v2535_v0 }
  0x35   : > { %s2632_s16 = scalar_select %p202_p6, %s2596_s30, 1  ;;  %v2657_v3 = vshrl.u32 %v233_v1, 7  ;;  %2136 = vmatprep.mubr.msk.bf16.mxu0 %vm2536_vm0, %v2535_v0  ;;  %2156 = vmatprep.mubr.msk.bf16.mxu1 %vm2536_vm0, %v2535_v0 }
  0x36   : > { %s2634_s17 = sld [smem:[#allocation3 + %s513_s14]]  ;;  %s523_s18 = sadd.s32 18, %s2625_s13 }
  0x37   : > { %3383 = sst [smem:[#allocation16_spill]] %s2632_s16  ;;  %s2029_s19 = sshll.u32 %s2632_s16, 7  ;;  %v2755_v34 = vsub.s32 0, %v2657_v3 }
  0x38   : > { %s2320_s20 = smul.u32 640, %s2632_s16  ;;  %s3384_s2 = sld [smem:[#allocation17_spill]] }
  0x39   : > { %s2644_s24 = sld [smem:[#allocation3 + %s518_s15]]  ;;  %s528_s8 = sadd.s32 19, %s2625_s13 }
  0x3a   : > { %s3385_s3 = sld [smem:[#allocation18_spill]]  ;;  %s533_s9 = sadd.s32 20, %s2625_s13 }
  0x3b   : > { %s2651_s6 = sld [smem:[#allocation3 + %s523_s18]]  ;;  %s538_s15 = sadd.s32 21, %s2625_s13 }
  0x3c   : > { %s2667_s14 = sld [smem:[#allocation3 + %s528_s8]]  ;;  %v515_v6 = vstv %s2634_s17  ;;  %s548_s21 = sadd.s32 23, %s2625_s13 }
  0x3d   : > { %s2671_s18 = sld [smem:[#allocation3 + %s533_s9]]  ;;  %s240_s25 = sadd.s32 1, %s2625_s13 }
  0x3e   : > { %s2642_s23 = scalar_lea.vmem %s3384_s2, %s2029_s19  ;;  %s543_s19 = sadd.s32 22, %s2625_s13 }
  0x3f   : > { %v2654_v2 = vld [vmem:[%s2642_s23] sm:$0xff]  ;;  %v2662_v4 = vld [vmem:[%s2642_s23 + $0x10] sm:$0xff]  ;;  %v520_v11 = vstv %s2644_s24  ;;  %s2686_s22 = sld [smem:[#allocation3 + %s543_s19]]  ;;  %s245_s8 = sadd.s32 2, %s2625_s13 }
  0x40   : > { %s2649_s0 = scalar_lea.vmem %s3385_s3, %s2320_s20  ;;  %v2665_v5 = vld [vmem:[%s2642_s23 + $0x20] sm:$0xff]  ;;  %v2677_v9 = vld [vmem:[%s2642_s23 + $0x30] sm:$0xff]  ;;  %s2679_s20 = sld [smem:[#allocation3 + %s538_s15]]  ;;  %v516_v13 = vmul.u32 %v515_v6, %v2654_v2  ;;  %v521_v17 = vmul.u32 %v520_v11, %v2662_v4 }
  0x41   : > { %v2365_v7 = vld [vmem:[%s2649_s0 + $0x38] sm:$0xff]   ;;  %v2366_v8 = vld [vmem:[%s2649_s0 + $0x30] sm:$0xff]   ;;  %v2683_v10 = vld [vmem:[%s2642_s23 + $0x40] sm:$0xff]  ;;  %v525_v14 = vstv %s2651_s6  ;;  %s2696_s26 = sld [smem:[#allocation3 + %s548_s21]]  ;;  %s250_s15 = sadd.s32 3, %s2625_s13 }
  0x42   : > { %2121 = vmatpush3.bf16.msra.mxu0 %v2365_v7  ;;  %v2690_v12 = vld [vmem:[%s2642_s23 + $0x50] sm:$0xff]  ;;  %v2367_v15 = vld [vmem:[%s2649_s0 + $0x78] sm:$0xff]   ;;  %v2702_v16 = vld [vmem:[%s2642_s23 + $0x60] sm:$0xff]  ;;  %v526_v18 = vmul.u32 %v525_v14, %v2665_v5  ;;  %s2711_s9 = sld [smem:[#allocation3 + %s2625_s13]]  ;;  %v530_v20 = vstv %s2667_s14  ;;  %s255_s21 = sadd.s32 4, %s2625_s13  ;;  %v553_v29 = vxor.u32 %v521_v17, %v516_v13 }
  0x43   : > { %2122 = vmatprep.subr.bf16.mxu0 %v2535_v0  ;;  %v2715_v19 = vld [vmem:[%s2642_s23 + $0x70] sm:$0xff]  ;;  %s2718_s19 = sld [smem:[#allocation3 + %s240_s25]]  ;;  %2141 = vmatpush3.bf16.msra.mxu1 %v2367_v15  ;;  %v2368_v21 = vld [vmem:[%s2649_s0 + $0x28] sm:$0xff]   ;;  %v531_v23 = vmul.u32 %v530_v20, %v2677_v9  ;;  %v535_v24 = vstv %s2671_s18  ;;  %s260_s3 = sadd.s32 5, %s2625_s13  ;;  %v2370_v38 = vld [vmem:[%s2649_s0 + $0x20] sm:$0xff]  }
  0x44   : > { %v2369_v22 = vld [vmem:[%s2649_s0 + $0x70] sm:$0xff]   ;;  %s2727_s2 = sld [smem:[#allocation3 + %s245_s8]]  ;;  %2142 = vmatprep.subr.bf16.mxu1 %v2535_v0  ;;  %v536_v25 = vmul.u32 %v535_v24, %v2683_v10  ;;  %s265_s10 = sadd.s32 6, %s2625_s13  ;;  %v2371_v31 = vld [vmem:[%s2649_s0 + $0x68] sm:$0xff]   ;;  %v2372_v47 = vld [vmem:[%s2649_s0 + $0x18] sm:$0xff]  }
  0x45   : > { %s2735_s25 = sld [smem:[#allocation3 + %s250_s15]]  ;;  %v545_v28 = vstv %s2686_s22  ;;  %v555_v30 = vxor.u32 %v531_v23, %v526_v18  ;;  %s270_s28 = sadd.s32 7, %s2625_s13  ;;  %v2373_v48 = vld [vmem:[%s2649_s0 + $0x60] sm:$0xff]   ;;  %v2375_v61 = vld [vmem:[%s2649_s0 + $0x58] sm:$0xff]  }
  0x46   : > { %2123 = vmatpush3.bf16.msra.mxu0 %v2366_v8  ;;  %v540_v26 = vstv %s2679_s20  ;;  %s2743_s8 = sld [smem:[#allocation3 + %s255_s21]]  ;;  %v546_v32 = vmul.u32 %v545_v28, %v2702_v16  ;;  %s369_s7 = sadd.s32 8, %s2625_s13  ;;  %v2374_v8 = vld [vmem:[%s2649_s0 + $0x10] sm:$0xff]  }
  0x47   : > { %2124 = vmatprep.subr.bf16.mxu0 %v2535_v0  ;;  %v541_v27 = vmul.u32 %v540_v26, %v2690_v12  ;;  %v550_v33 = vstv %s2696_s26  ;;  %s2751_s15 = sld [smem:[#allocation3 + %s260_s3]]  ;;  %2143 = vmatpush3.bf16.msra.mxu1 %v2369_v22  ;;  %s374_s12 = sadd.s32 9, %s2625_s13  ;;  %v561_v42 = vxor.u32 %v555_v30, %v553_v29  ;;  %v2377_v29 = vld [vmem:[%s2649_s0 + $0x50] sm:$0xff]  }
  0x48   : > { %v551_v35 = vmul.u32 %v550_v33, %v2715_v19  ;;  %v237_v37 = vstv %s2711_s9  ;;  %s2761_s21 = sld [smem:[#allocation3 + %s265_s10]]  ;;  %2144 = vmatprep.subr.bf16.mxu1 %v2535_v0  ;;  %s379_s1 = sadd.s32 10, %s2625_s13 }
  0x49   : > { %v557_v36 = vxor.u32 %v541_v27, %v536_v25  ;;  %v238_v39 = vmul.u32 %v237_v37, %v2654_v2  ;;  %v242_v40 = vstv %s2718_s19  ;;  %s2770_s3 = sld [smem:[#allocation3 + %s270_s28]]  ;;  %s384_s29 = sadd.s32 11, %s2625_s13 }
  0x4a   : > { %2125 = vmatpush3.bf16.msra.mxu0 %v2368_v21  ;;  %v559_v41 = vxor.u32 %v551_v35, %v546_v32  ;;  %v243_v43 = vmul.u32 %v242_v40, %v2662_v4  ;;  %v247_v44 = vstv %s2727_s2  ;;  %s2778_s10 = sld [smem:[#allocation3 + %s369_s7]]  ;;  %s389_s5 = sadd.s32 12, %s2625_s13 }
  0x4b   : > { %2126 = vmatprep.subr.bf16.mxu0 %v2535_v0  ;;  %v248_v45 = vmul.u32 %v247_v44, %v2665_v5  ;;  %v252_v46 = vstv %s2735_s25  ;;  %s2785_s28 = sld [smem:[#allocation3 + %s374_s12]]  ;;  %2145 = vmatpush3.bf16.msra.mxu1 %v2371_v31  ;;  %s394_s11 = sadd.s32 13, %s2625_s13  ;;  %v2849_v31 = vsub.s32 1, %v2657_v3 }
  0x4c   : > { %v563_v49 = vxor.u32 %v559_v41, %v557_v36  ;;  %v253_v50 = vmul.u32 %v252_v46, %v2677_v9  ;;  %v257_v51 = vstv %s2743_s8  ;;  %s2794_s7 = sld [smem:[#allocation3 + %s379_s1]]  ;;  %2146 = vmatprep.subr.bf16.mxu1 %v2535_v0  ;;  %v275_v54 = vxor.u32 %v243_v43, %v238_v39  ;;  %s399_s4 = sadd.s32 14, %s2625_s13 }
  0x4d   : > { %v258_v52 = vmul.u32 %v257_v51, %v2683_v10  ;;  %v262_v53 = vstv %s2751_s15  ;;  %s2802_s12 = sld [smem:[#allocation3 + %s384_s29]]  ;;  %s404_s16 = sadd.s32 15, %s2625_s13 }
  0x4e   : > { %2127 = vmatpush3.bf16.msra.mxu0 %v2370_v38  ;;  %v2806_v55 = vxor.u32 %v563_v49, %v561_v42  ;;  %v263_v56 = vmul.u32 %v262_v53, %v2690_v12  ;;  %v267_v57 = vstv %s2761_s21  ;;  %v277_v58 = vxor.u32 %v253_v50, %v248_v45  ;;  %s2812_s1 = sld [smem:[#allocation3 + %s389_s5]]  ;;  %v2378_v45 = vld [vmem:[%s2649_s0] sm:$0xff]   ;;  %s2538_s15 = smov [#allocation5]  }
  0x4f   : > { %2128 = vmatprep.subr.bf16.mxu0 %v2535_v0  ;;  %v268_v59 = vmul.u32 %v267_v57, %v2702_v16  ;;  %v272_v60 = vstv %s2770_s3  ;;  %s2819_s29 = sld [smem:[#allocation3 + %s394_s11]]  ;;  %2147 = vmatpush3.bf16.msra.mxu1 %v2373_v48  ;;  %s2473_s21 = sshll.u32 %s2538_s15, 4  ;;  %s2474_s21 = int_to_ptr.vmem [resolvable:$false] %s2473_s21 }
  0x50   : > { %v570_v62 = vrot.slane %v2806_v55, %v2755_v34  ;;  %v273_v63 = vmul.u32 %v272_v60, %v2715_v19  ;;  %v279_v7 = vxor.u32 %v263_v56, %v258_v52  ;;  %s2827_s5 = sld [smem:[#allocation3 + %s399_s4]]  ;;  %v283_v13 = vxor.u32 %v277_v58, %v275_v54  ;;  %2148 = vmatprep.subr.bf16.mxu1 %v2535_v0  ;;  %v2380_v56 = vld [vmem:[%s2649_s0 + $0x40] sm:$0xff]   ;;  %s2475_s3 = scalar_lea.vmem %s2474_s21, 256 }
  0x51   : > { %v371_v15 = vstv %s2778_s10  ;;  %v376_v17 = vstv %s2785_s28  ;;  %s2832_s11 = sld [smem:[#allocation3 + %s404_s16]]  ;;  %v577_v52 = vrot.slane %v2806_v55, %v2849_v31  ;;  %v305_v54 = vsub.s32 2, %v2657_v3  ;;  %s199_s16 = sand.u32 1, %s2523_s27  }
  0x52   : > { %2129 = vmatpush3.bf16.msra.mxu0 %v2372_v47  ;;  %572 = vbcast.lane.b32.xlu1 %v570_v62, 256  ;;  %v281_v18 = vxor.u32 %v273_v63, %v268_v59  ;;  %v372_v21 = vmul.u32 %v371_v15, %v2654_v2  ;;  %v377_v22 = vmul.u32 %v376_v17, %v2662_v4  ;;  %v381_v23 = vstv %s2794_s7  ;;  %s216_s2 = sld [smem:[#allocation4 + %s2596_s30]]  ;;  %s1899_s17 = sshll.u32 %s199_s16, 3 }
  0x53   : > { %2130 = vmatprep.subr.bf16.mxu0 %v2535_v0  ;;  %v382_v25 = vmul.u32 %v381_v23, %v2665_v5  ;;  %v386_v27 = vstv %s2802_s12  ;;  %2149 = vmatpush3.bf16.msra.mxu1 %v2375_v61  ;;  %v2376_v5 = vld [vmem:[%s2649_s0 + $0x8] sm:$0xff]   ;;  %v312_v59 = vsub.s32 3, %v2657_v3  ;;  %s3418_s30 = sld [smem:[#allocation16_spill]]  ;;  %s201_s18 = scalar_lea.vmem [#allocation5], %s1899_s17 }
  0x54   : > { %v285_v30 = vxor.u32 %v281_v18, %v279_v7  ;;  %v387_v2 = vmul.u32 %v386_v27, %v2677_v9  ;;  %v391_v4 = vstv %s2812_s1  ;;  %2150 = vmatprep.subr.bf16.mxu1 %v2535_v0  ;;  %v409_v36 = vxor.u32 %v377_v22, %v372_v21  ;;  %s1815_s20 = sshll.u32 %s201_s18, 4  ;;  %s3421_s9 = sld [smem:[#allocation20_spill]]  ;;  %s1816_s20 = int_to_ptr.vmem [resolvable:$true] %s1815_s20 }
  0x55   : > { %v392_v32 = vmul.u32 %v391_v4, %v2683_v10  ;;  %v396_v35 = vstv %s2819_s29  ;;  %v591_v18 = vrot.slane %v2806_v55, %v312_v59  ;;  %v2907_v21 = vsub.s32 5, %v2657_v3  ;;  %s1802_s25 = scalar_lea.sflag [#allocation6], %s199_s16  ;;  %s2469_s8 = scalar_lea.vmem %s1816_s20, 128 }
  0x56   : > { %2131 = vmatpush3.bf16.msra.mxu0 %v2374_v8  ;;  %v2862_v38 = vxor.u32 %v285_v30, %v283_v13  ;;  %v397_v9 = vmul.u32 %v396_v35, %v2690_v12  ;;  %v401_v39 = vstv %s2827_s5  ;;  %v411_v41 = vxor.u32 %v387_v2, %v382_v25  ;;  %v2379_v12 = vld [vmem:[%s2649_s0 + $0x48] sm:$0xff]   ;;  %v220_v30 = vld [vmem:[%s2642_s23 + $0x18] sm:$0x3]  ;;  %p2470_p8 = scmp.ne.s32.totalorder %s1816_s20, %s2469_s8  ;;  %p2476_p11 = scmp.lt.s32.totalorder %s1816_s20, %s2474_s21 }
  0x57   : > { %2132 = vmatprep.subr.bf16.mxu0 %v2535_v0  ;;  %v402_v42 = vmul.u32 %v401_v39, %v2702_v16  ;;  %v406_v43 = vstv %s2832_s11  ;;  %2151 = vmatpush3.bf16.msra.mxu1 %v2377_v29  ;;  %v319_v8 = vsub.s32 4, %v2657_v3  ;;  %v584_v22 = vrot.slane %v2806_v55, %v305_v54  ;;  %v218_v29 = vld [vmem:[%s2642_s23 + $0x8] sm:$0x3]  ;;  %p2477_p12 = scmp.lt.s32.totalorder %s2475_s3, %s2469_s8 }
  0x58   : > { %v292_v10 = vrot.slane %v2862_v38, %v2755_v34  ;;  %v299_v47 = vrot.slane %v2862_v38, %v2849_v31  ;;  %v407_v48 = vmul.u32 %v406_v43, %v2715_v19  ;;  %v413_v49 = vxor.u32 %v397_v9, %v392_v32  ;;  %2152 = vmatprep.subr.bf16.mxu1 %v2535_v0  ;;  %v222_v2 = vld [vmem:[%s2642_s23 + $0x28] sm:$0x3]  ;;  %p647_p7 = scmp.gt.s32.totalorder %s216_s2, 2  ;;  %p2471_p9 = pnand %p2470_p8, %p2613_p1 }
  0x59   : > { %v417_v50 = vxor.u32 %v411_v41, %v409_v36  ;;  %v313_v7 = vrot.slane %v2862_v38, %v312_v59  ;;  %v306_v13 = vrot.slane %v2862_v38, %v305_v54  ;;  %v226_v32 = vld [vmem:[%s2642_s23 + $0x48] sm:$0x3]  ;;  %v228_v36 = vld [vmem:[%s2642_s23 + $0x58] sm:$0x3]  ;;  %p2478_p13 = por %p2477_p12, %p2476_p11 }
  0x5a   : > { %2133 = vmatpush3.bf16.msra.mxu0 %v2376_v5  ;;  %294 = vbcast.lane.b32.xlu0 %v292_v10, 256  ;;  %v415_v16 = vxor.u32 %v407_v48, %v402_v42  ;;  %v224_v5 = vld [vmem:[%s2642_s23 + $0x38] sm:$0x3]  ;;  %v230_v9 = vld [vmem:[%s2642_s23 + $0x68] sm:$0x3]  ;;  %v327_v42 = vrot.slane %v2862_v38, %v2907_v21  ;;  %v373_v10 = vmul.u32 %v371_v15, %v218_v29  ;;  %v2927_v48 = vsub.s32 6, %v2657_v3  ;;  %s1813_s19 = scalar_lea.hbm %s3421_s9, %s2625_s13  ;;  %p2472_p10 = pneg %p2471_p9 }
  0x5b   : > { %2134 = vmatprep.subr.bf16.mxu0 %v2535_v0  ;;  %301 = vbcast.lane.b32.xlu1 %v299_v47, 256  ;;  %v378_v47 = vmul.u32 %v376_v17, %v220_v30  ;;  %v320_v15 = vrot.slane %v2862_v38, %v319_v8  ;;  %v403_v17 = vmul.u32 %v401_v39, %v230_v9  ;;  %s648_s4 = scalar_select %p647_p7, 1, 0 }
  0x5c   : > { %v419_v19 = vxor.u32 %v415_v16, %v413_v49  ;;  %2153 = vmatpush3.bf16.msra.mxu1 %v2379_v12  ;;  %v383_v49 = vmul.u32 %v381_v23, %v222_v2  ;;  %v388_v12 = vmul.u32 %v386_v27, %v224_v5  ;;  %v605_v16 = vrot.slane %v2806_v55, %v2907_v21  ;;  %p2479_p0 = pnand %p2478_p13, %p2472_p10 }
  0x5d   : > { %2154 = vmatprep.subr.bf16.mxu1 %v2535_v0  ;;  %v598_v27 = vrot.slane %v2806_v55, %v319_v8  ;;  %v244_v39 = vmul.u32 %v242_v40, %v220_v30 }
  0x5e   : > { %2135 = vmatpush3.bf16.msra.mxu0 %v2378_v45  ;;  %v2891_v58 = vxor.u32 %v419_v19, %v417_v50  ;;  %v232_v45 = vld [vmem:[%s2642_s23 + $0x78] sm:$0x3]  ;;  %v393_v50 = vmul.u32 %v391_v4, %v226_v32  ;;  %v340_v19 = vsub.s32 7, %v2657_v3  ;;  %v410_v4 = vxor.u32 %v378_v47, %v373_v10 }
  0x5f   : > { %2160 = vmatprep.subr.bf16.mxu0 %v2535_v0  ;;  %579 = vbcast.lane.b32.xlu1 %v577_v52, 256  ;;  %v398_v52 = vmul.u32 %v396_v35, %v228_v36  ;;  %v408_v23 = vmul.u32 %v406_v43, %v232_v45  ;;  %v412_v35 = vxor.u32 %v388_v12, %v383_v49 }
  0x60   : > { %v426_v61 = vrot.slane %v2891_v58, %v2755_v34  ;;  %v440_v62 = vrot.slane %v2891_v58, %v305_v54  ;;  %2155 = vmatpush3.bf16.msra.mxu1 %v2380_v56  ;;  %v433_v63 = vrot.slane %v2891_v58, %v2849_v31  ;;  %v454_v25 = vrot.slane %v2891_v58, %v319_v8 }
  0x61   : > { %2180 = vmatprep.subr.bf16.mxu1 %v2535_v0  ;;  %v447_v41 = vrot.slane %v2891_v58, %v312_v59  ;;  %v468_v54 = vrot.slane %v2891_v58, %v2927_v48  ;;  %v414_v56 = vxor.u32 %v398_v52, %v393_v50  ;;  %v239_v59 = vmul.u32 %v237_v37, %v218_v29 }
  0x62   : > { %428 = vbcast.lane.b32.xlu0 %v426_v61, 256  ;;  %v416_v43 = vxor.u32 %v408_v23, %v403_v17  ;;  %v249_v3 = vmul.u32 %v247_v44, %v222_v2  ;;  %v254_v61 = vmul.u32 %v252_v46, %v224_v5  ;;  %v461_v8 = vrot.slane %v2891_v58, %v2907_v21 }
  0x63   : > { %442 = vbcast.lane.b32.xlu1 %v440_v62, 256  ;;  %v259_v62 = vmul.u32 %v257_v51, %v226_v32  ;;  %v269_v37 = vmul.u32 %v267_v57, %v230_v9  ;;  %v418_v44 = vxor.u32 %v412_v35, %v410_v4  ;;  %v276_v57 = vxor.u32 %v244_v39, %v239_v59  ;;  %v2383_v4 = vld [vmem:[%s2649_s0 + $0xf8] sm:$0xff]   ;;  %v2384_v35 = vld [vmem:[%s2649_s0 + $0xa8] sm:$0xff]  }
  0x64   : > { %v274_v40 = vmul.u32 %v272_v60, %v232_v45  ;;  %v517_v46 = vmul.u32 %v515_v6, %v218_v29  ;;  %v649_v50 = vstv %s648_s4  ;;  %v2387_v59 = vld [vmem:[%s2649_s0 + $0xe8] sm:$0xff]  }
  0x65   : > { %v522_v51 = vmul.u32 %v520_v11, %v220_v30  ;;  %v537_v60 = vmul.u32 %v535_v24, %v226_v32  ;;  %v334_v11 = vrot.slane %v2862_v38, %v2927_v48  ;;  %vm2999_vm1 = vcmp.eq.s32.totalorder %v649_v50, 1  ;;  %v2415_v50 = vld [vmem:[%s2649_s0 + $0x1f8] sm:$0xff]  }
  0x66   : > { %435 = vbcast.lane.b32.xlu0 %v433_v63, 256  ;;  %v264_v63 = vmul.u32 %v262_v53, %v228_v36  ;;  %v420_v53 = vxor.u32 %v416_v43, %v414_v56  ;;  %v552_v6 = vmul.u32 %v550_v33, %v232_v45  ;;  %v2386_v56 = vld [vmem:[%s2649_s0 + $0xa0] sm:$0xff]  }
  0x67   : > { %315 = vbcast.lane.b32.xlu1 %v313_v7, 256  ;;  %v341_v7 = vrot.slane %v2862_v38, %v340_v19  ;;  %v554_v30 = vxor.u32 %v522_v51, %v517_v46  ;;  %v2430_v51 = vld [vmem:[%s2649_s0 + $0x230] sm:$0xff]  }
  0x68   : > { %v280_v21 = vxor.u32 %v264_v63, %v259_v62  ;;  %v2390_v63 = vld [vmem:[%s2649_s0 + $0x90] sm:$0xff]  }
  0x6a   : > { %308 = vbcast.lane.b32.xlu0 %v306_v13, 256  ;;  %v527_v13 = vmul.u32 %v525_v14, %v222_v2  ;;  %v619_v14 = vrot.slane %v2806_v55, %v340_v19 }
  0x6b   : > { %593 = vbcast.lane.b32.xlu1 %v591_v18, 256  ;;  %v532_v18 = vmul.u32 %v530_v20, %v224_v5  ;;  %v422_v20 = vxor.u32 %v420_v53, %v418_v44  ;;  %v2431_v53 = vld [vmem:[%s2649_s0 + $0x278] sm:$0xff]  }
  0x6d   : > { %v556_v24 = vxor.u32 %v532_v18, %v527_v13  ;;  %v482_v33 = vrot.slane %v422_v20, %v2755_v34  ;;  %v489_v49 = vrot.slane %v422_v20, %v2849_v31  ;;  %v2394_v13 = vld [vmem:[%s2649_s0 + $0x80] sm:$0xff]   ;;  %v2395_v18 = vld [vmem:[%s2649_s0 + $0xc8] sm:$0xff]  }
  0x6e   : > { %586 = vbcast.lane.b32.xlu0 %v584_v22, 256  ;;  %v278_v22 = vxor.u32 %v254_v61, %v249_v3  ;;  %v2388_v3 = vld [vmem:[%s2649_s0 + $0x98] sm:$0xff]   ;;  %v2389_v61 = vld [vmem:[%s2649_s0 + $0xe0] sm:$0xff]  }
  0x6f   : > { %456 = vbcast.lane.b32.xlu1 %v454_v25, 256  ;;  %v542_v25 = vmul.u32 %v540_v26, %v228_v36  ;;  %v562_v36 = vxor.u32 %v556_v24, %v554_v30  ;;  %v2404_v30 = vld [vmem:[%s2649_s0 + $0x118] sm:$0xff]  }
  0x70   : > { %v284_v29 = vxor.u32 %v278_v22, %v276_v57  ;;  %v2434_v57 = vld [vmem:[%s2649_s0 + $0x220] sm:$0xff]   ;;  %v2435_v22 = vld [vmem:[%s2649_s0 + $0x268] sm:$0xff]  }
  0x71   : > { %v558_v5 = vxor.u32 %v542_v25, %v537_v60  ;;  %v2396_v60 = vld [vmem:[%s2649_s0 + $0xc0] sm:$0xff]   ;;  %v2397_v25 = vld [vmem:[%s2649_s0 + $0x138] sm:$0xff]  }
  0x72   : > { %449 = vbcast.lane.b32.xlu0 %v447_v41, 256  ;;  %v282_v41 = vxor.u32 %v274_v40, %v269_v37  ;;  %v2392_v40 = vld [vmem:[%s2649_s0 + $0x88] sm:$0xff]  }
  0x73   : > { %329 = vbcast.lane.b32.xlu1 %v327_v42, 256  ;;  %v547_v42 = vmul.u32 %v545_v28, %v230_v9  ;;  %v612_v28 = vrot.slane %v2806_v55, %v2927_v48  ;;  %v475_v9 = vrot.slane %v2891_v58, %v340_v19  ;;  %v2382_v19 = vld [vmem:[%s2649_s0 + $0xb0] sm:$0xff]  }
  0x74   : > { %v286_v2 = vxor.u32 %v282_v41, %v280_v21  ;;  %v2398_v21 = vld [vmem:[%s2649_s0 + $0x130] sm:$0xff]   ;;  %v2399_v41 = vld [vmem:[%s2649_s0 + $0x178] sm:$0xff]  }
  0x75   : > { %v560_v26 = vxor.u32 %v552_v6, %v547_v42  ;;  %v2400_v42 = vld [vmem:[%s2649_s0 + $0x128] sm:$0xff]   ;;  %v2401_v6 = vld [vmem:[%s2649_s0 + $0x170] sm:$0xff]  }
  0x76   : > { %322 = vbcast.lane.b32.xlu0 %v320_v15, 256  ;;  %v288_v32 = vxor.u32 %v286_v2, %v284_v29  ;;  %v2405_v2 = vld [vmem:[%s2649_s0 + $0x160] sm:$0xff]  }
  0x77   : > { %607 = vbcast.lane.b32.xlu1 %v605_v16, 256  ;;  %v564_v38 = vxor.u32 %v560_v26, %v558_v5  ;;  %v2997_v16 = vand.u32 127, %v233_v1  ;;  %v2406_v5 = vld [vmem:[%s2649_s0 + $0x110] sm:$0xff]   ;;  %v2407_v26 = vld [vmem:[%s2649_s0 + $0x158] sm:$0xff]   ;;  %v2419_v1 = vld [vmem:[%s2649_s0 + $0x1e8] sm:$0xff]  }
  0x78   : > { %v355_v45 = vrot.slane %v288_v32, %v2849_v31  ;;  %v348_v47 = vrot.slane %v288_v32, %v2755_v34  ;;  %v2409_v32 = vld [vmem:[%s2649_s0 + $0x150] sm:$0xff]  }
  0x79   : > { %v566_v10 = vxor.u32 %v564_v38, %v562_v36 }
  0x7a   : > { %600 = vbcast.lane.b32.xlu0 %v598_v27, 256  ;;  %v2537_v27 = vmov 1.0|1.0  }
  0x7b   : > { %470 = vbcast.lane.b32.xlu1 %v468_v54, 256  ;;  %v633_v55 = vrot.slane %v566_v10, %v2849_v31  ;;  %v626_v48 = vrot.slane %v566_v10, %v2755_v34  ;;  %v2381_v31 = vld [vmem:[%s2649_s0 + $0xb8] sm:$0xff]   ;;  %v2385_v54 = vld [vmem:[%s2649_s0 + $0xf0] sm:$0xff]   ;;  %v2410_v10 = vld [vmem:[%s2649_s0 + $0x100] sm:$0xff]  }
  0x7e   : > { %463 = vbcast.lane.b32.xlu0 %v461_v8, 256  ;;  %v2393_v8 = vld [vmem:[%s2649_s0 + $0xd0] sm:$0xff]  }
  0x7f   : > { %343 = vbcast.lane.b32.xlu1 %v341_v7, 256  ;;  %v2391_v7 = vld [vmem:[%s2649_s0 + $0xd8] sm:$0xff]  }
  0x82   : > { %336 = vbcast.lane.b32.xlu0 %v334_v11, 256  ;;  %v2402_v11 = vld [vmem:[%s2649_s0 + $0x120] sm:$0xff]  }
  0x83   : > { %621 = vbcast.lane.b32.xlu1 %v619_v14, 256  ;;  %v2403_v14 = vld [vmem:[%s2649_s0 + $0x168] sm:$0xff]  }
  0x86   : > { %614 = vbcast.lane.b32.xlu0 %v612_v28, 256 }
  0x87   : > { %484 = vbcast.lane.b32.xlu1 %v482_v33, 256  ;;  %v2408_v33 = vld [vmem:[%s2649_s0 + $0x108] sm:$0xff]  }
  0x8a   : > { %477 = vbcast.lane.b32.xlu0 %v475_v9, 256 }
  0x8b   : > { %357 = vbcast.lane.b32.xlu1 %v355_v45, 256 }
  0x8e   : > { %350 = vbcast.lane.b32.xlu0 %v348_v47, 256  ;;  %v2411_v47 = vld [vmem:[%s2649_s0 + $0x148] sm:$0xff]  }
  0x8f   : > { %635 = vbcast.lane.b32.xlu1 %v633_v55, 256 }
  0x92   : > { %628 = vbcast.lane.b32.xlu0 %v626_v48, 256 }
  0x96   : > { %491 = vbcast.lane.b32.xlu0 %v489_v49, 256  ;;  %v2412_v49 = vld [vmem:[%s2649_s0 + $0x140] sm:$0xff]  }
  0xc4   : > { %v573_v58 = vpop.permute.xlu1 %572 }
  0xc5   : > { %vm637_vm2 = vcmp.eq.s32.totalorder %v573_v58, %v2997_v16  ;;  %v2413_v58 = vld [vmem:[%s2649_s0 + $0x1b8] sm:$0xff]  }
  0xc6   : > { %vm651_vm4 = vmand %vm637_vm2, %vm2999_vm1 }
  0xcc   : > { %v295_v52 = vpop.permute.xlu0 %294 }
  0xcd   : > { %v302_v12 = vpop.permute.xlu1 %301  ;;  %vm359_vm5 = vcmp.eq.s32.totalorder %v295_v52, %v2997_v16  ;;  %v2416_v52 = vld [vmem:[%s2649_s0 + $0x1a8] sm:$0xff]  }
  0xce   : > { %vm360_vm11 = vcmp.eq.s32.totalorder %v302_v12, %v2997_v16  ;;  %v2414_v12 = vld [vmem:[%s2649_s0 + $0x1b0] sm:$0xff]  }
  0xd1   : > { %v580_v15 = vpop.permute.xlu1 %579 }
  0xd2   : > { %vm638_vm3 = vcmp.eq.s32.totalorder %v580_v15, %v2997_v16  ;;  %v2417_v15 = vld [vmem:[%s2649_s0 + $0x1f0] sm:$0xff]  }
  0xd3   : > { %vm3011_vm7 = vmand %vm638_vm3, %vm2999_vm1 }
  0xd4   : > { %v429_v34 = vpop.permute.xlu0 %428 }
  0xd5   : > { %vm493_vm6 = vcmp.eq.s32.totalorder %v429_v34, %v2997_v16  ;;  %v443_v39 = vpop.permute.xlu1 %442  ;;  %v2418_v34 = vld [vmem:[%s2649_s0 + $0x1a0] sm:$0xff]  }
  0xd6   : > { %vm503_vm8 = vmor %vm359_vm5, %vm493_vm6  ;;  %vm495_vm2 = vcmp.eq.s32.totalorder %v443_v39, %v2997_v16  ;;  %v2424_v39 = vld [vmem:[%s2649_s0 + $0x188] sm:$0xff]  }
  0xd7   : > { %vm661_vm9 = vmor %vm503_vm8, %vm651_vm4 }
  0xd8   : > { %vm1922_vm10 = vmpackc.low %vm661_vm9, %vm661_vm9  ;;  %v436_v23 = vpop.permute.xlu0 %435 }
  0xd9   : > { %vm494_vm12 = vcmp.eq.s32.totalorder %v436_v23, %v2997_v16  ;;  %2137 = vmatmul.mubr.msk.bf16.vlgmr.msra.gmra.mxu0 %vm1922_vm10, %v2537_v27  ;;  %v316_v62 = vpop.permute.xlu1 %315 }
  0xda   : > { %vm504_vm13 = vmor %vm360_vm11, %vm494_vm12  ;;  %2161 = vmatpush3.bf16.msra.mxu0 %v2381_v31  ;;  %2176 = vmatprep.mubr.msk.bf16.mxu0 %vm2536_vm0, %v2535_v0  ;;  %vm362_vm8 = vcmp.eq.s32.totalorder %v316_v62, %v2997_v16 }
  0xdb   : > { %vm662_vm14 = vmor %vm504_vm13, %vm3011_vm7  ;;  %2162 = vmatprep.subr.bf16.mxu0 %v2535_v0 }
  0xdc   : > { %vm1932_vm15 = vmpackc.low %vm662_vm14, %vm662_vm14  ;;  %v309_v43 = vpop.permute.xlu0 %308 }
  0xdd   : > { %2157 = vmatmul.mubr.msk.bf16.vlgmr.msra.gmra.mxu1 %vm1932_vm15, %v2537_v27  ;;  %vm361_vm3 = vcmp.eq.s32.totalorder %v309_v43, %v2997_v16  ;;  %v594_v44 = vpop.permute.xlu1 %593  ;;  %v2425_v43 = vld [vmem:[%s2649_s0 + $0x1d0] sm:$0xff]  }
  0xde   : > { %2163 = vmatpush3.bf16.msra.mxu0 %v2382_v19  ;;  %2181 = vmatpush3.bf16.msra.mxu1 %v2383_v4  ;;  %vm3052_vm5 = vmor %vm361_vm3, %vm495_vm2  ;;  %vm640_vm6 = vcmp.eq.s32.totalorder %v594_v44, %v2997_v16  ;;  %v2420_v19 = vld [vmem:[%s2649_s0 + $0x198] sm:$0xff]   ;;  %v2421_v4 = vld [vmem:[%s2649_s0 + $0x1e0] sm:$0xff]  }
  0xdf   : > { %2164 = vmatprep.subr.bf16.mxu0 %v2535_v0  ;;  %2182 = vmatprep.subr.bf16.mxu1 %v2535_v0  ;;  %vm3071_vm10 = vmand %vm640_vm6, %vm2999_vm1  ;;  %v2428_v44 = vld [vmem:[%s2649_s0 + $0x1c0] sm:$0xff]  }
  0xe0   : > { %2196 = vmatprep.mubr.msk.bf16.mxu1 %vm2536_vm0, %v2535_v0  ;;  %v587_v37 = vpop.permute.xlu0 %586 }
  0xe1   : > { %vm639_vm4 = vcmp.eq.s32.totalorder %v587_v37, %v2997_v16  ;;  %v457_v20 = vpop.permute.xlu1 %456  ;;  %v2427_v37 = vld [vmem:[%s2649_s0 + $0x1c8] sm:$0xff]  }
  0xe2   : > { %2165 = vmatpush3.bf16.msra.mxu0 %v2384_v35  ;;  %2183 = vmatpush3.bf16.msra.mxu1 %v2385_v54  ;;  %vm3059_vm7 = vmand %vm639_vm4, %vm2999_vm1  ;;  %vm497_vm2 = vcmp.eq.s32.totalorder %v457_v20, %v2997_v16  ;;  %v2422_v54 = vld [vmem:[%s2649_s0 + $0x190] sm:$0xff]   ;;  %v2440_v20 = vld [vmem:[%s2649_s0 + $0x208] sm:$0xff]  }
  0xe3   : > { %2166 = vmatprep.subr.bf16.mxu0 %v2535_v0  ;;  %2184 = vmatprep.subr.bf16.mxu1 %v2535_v0  ;;  %vm663_vm11 = vmor %vm3052_vm5, %vm3059_vm7 }
  0xe4   : > { %v450_v46 = vpop.permute.xlu0 %449  ;;  %vm1942_vm13 = vmpackc.low %vm663_vm11, %vm663_vm11 }
  0xe5   : > { %vm496_vm9 = vcmp.eq.s32.totalorder %v450_v46, %v2997_v16  ;;  %v330_v24 = vpop.permute.xlu1 %329  ;;  %v2429_v46 = vld [vmem:[%s2649_s0 + $0x238] sm:$0xff]  }
  0xe6   : > { %2167 = vmatpush3.bf16.msra.mxu0 %v2386_v56  ;;  %2185 = vmatpush3.bf16.msra.mxu1 %v2387_v59  ;;  %vm3079_vm12 = vmor %vm362_vm8, %vm496_vm9  ;;  %vm364_vm8 = vcmp.eq.s32.totalorder %v330_v24, %v2997_v16  ;;  %v2423_v56 = vld [vmem:[%s2649_s0 + $0x1d8] sm:$0xff]  }
  0xe7   : > { %2168 = vmatprep.subr.bf16.mxu0 %v2535_v0  ;;  %2186 = vmatprep.subr.bf16.mxu1 %v2535_v0  ;;  %vm664_vm14 = vmor %vm3079_vm12, %vm3071_vm10 }
  0xe8   : > { %vm1952_vm15 = vmpackc.low %vm664_vm14, %vm664_vm14  ;;  %v323_v29 = vpop.permute.xlu0 %322 }
  0xe9   : > { %vm363_vm3 = vcmp.eq.s32.totalorder %v323_v29, %v2997_v16  ;;  %v608_v36 = vpop.permute.xlu1 %607  ;;  %v2441_v29 = vld [vmem:[%s2649_s0 + $0x250] sm:$0xff]  }
  0xea   : > { %2169 = vmatpush3.bf16.msra.mxu0 %v2388_v3  ;;  %2187 = vmatpush3.bf16.msra.mxu1 %v2389_v61  ;;  %vm3124_vm5 = vmor %vm363_vm3, %vm497_vm2  ;;  %vm642_vm6 = vcmp.eq.s32.totalorder %v608_v36, %v2997_v16 }
  0xeb   : > { %2170 = vmatprep.subr.bf16.mxu0 %v2535_v0  ;;  %2188 = vmatprep.subr.bf16.mxu1 %v2535_v0  ;;  %vm3143_vm10 = vmand %vm642_vm6, %vm2999_vm1 }
  0xec   : > { %v601_v28 = vpop.permute.xlu0 %600 }
  0xed   : > { %vm641_vm4 = vcmp.eq.s32.totalorder %v601_v28, %v2997_v16  ;;  %v471_v31 = vpop.permute.xlu1 %470  ;;  %v2443_v28 = vld [vmem:[%s2649_s0 + $0x248] sm:$0xff]  }
  0xee   : > { %2171 = vmatpush3.bf16.msra.mxu0 %v2390_v63  ;;  %2189 = vmatpush3.bf16.msra.mxu1 %v2391_v7  ;;  %vm3131_vm7 = vmand %vm641_vm4, %vm2999_vm1  ;;  %vm499_vm2 = vcmp.eq.s32.totalorder %v471_v31, %v2997_v16  ;;  %v2426_v7 = vld [vmem:[%s2649_s0 + $0x180] sm:$0xff]  }
  0xef   : > { %2172 = vmatprep.subr.bf16.mxu0 %v2535_v0  ;;  %2190 = vmatprep.subr.bf16.mxu1 %v2535_v0  ;;  %vm665_vm11 = vmor %vm3124_vm5, %vm3131_vm7 }
  0xf0   : > { %v464_v38 = vpop.permute.xlu0 %463 }
  0xf1   : > { %vm498_vm9 = vcmp.eq.s32.totalorder %v464_v38, %v2997_v16  ;;  %v344_v35 = vpop.permute.xlu1 %343 }
  0xf2   : > { %2173 = vmatpush3.bf16.msra.mxu0 %v2392_v40  ;;  %2191 = vmatpush3.bf16.msra.mxu1 %v2393_v8  ;;  %vm3151_vm12 = vmor %vm364_vm8, %vm498_vm9  ;;  %vm366_vm8 = vcmp.eq.s32.totalorder %v344_v35, %v2997_v16 }
  0xf3   : > { %2174 = vmatprep.subr.bf16.mxu0 %v2535_v0  ;;  %2192 = vmatprep.subr.bf16.mxu1 %v2535_v0  ;;  %vm666_vm14 = vmor %vm3151_vm12, %vm3143_vm10 }
  0xf4   : > { %v337_v23 = vpop.permute.xlu0 %336 }
  0xf5   : > { %vm365_vm3 = vcmp.eq.s32.totalorder %v337_v23, %v2997_v16  ;;  %v622_v3 = vpop.permute.xlu1 %621 }
  0xf6   : > { %2175 = vmatpush3.bf16.msra.mxu0 %v2394_v13  ;;  %2193 = vmatpush3.bf16.msra.mxu1 %v2395_v18  ;;  %vm3196_vm5 = vmor %vm365_vm3, %vm499_vm2  ;;  %vm644_vm6 = vcmp.eq.s32.totalorder %v622_v3, %v2997_v16  ;;  %v2432_v13 = vld [vmem:[%s2649_s0 + $0x228] sm:$0xff]   ;;  %v2433_v18 = vld [vmem:[%s2649_s0 + $0x270] sm:$0xff]  }
  0xf7   : > { %2194 = vmatprep.subr.bf16.mxu1 %v2535_v0  ;;  %2200 = vmatprep.subr.bf16.mxu0 %v2535_v0  ;;  %vm3215_vm10 = vmand %vm644_vm6, %vm2999_vm1 }
  0xf8   : > { %v615_v59 = vpop.permute.xlu0 %614 }
  0xf9   : > { %2177 = vmatmul.mubr.msk.bf16.vlgmr.msra.gmra.mxu0 %vm1942_vm13, %v2537_v27  ;;  %vm1962_vm13 = vmpackc.low %vm665_vm11, %vm665_vm11  ;;  %vm643_vm4 = vcmp.eq.s32.totalorder %v615_v59, %v2997_v16 }
  0xfa   : > { %2195 = vmatpush3.bf16.msra.mxu1 %v2396_v60  ;;  %2201 = vmatpush3.bf16.msra.mxu0 %v2397_v25  ;;  %vm3203_vm7 = vmand %vm643_vm4, %vm2999_vm1  ;;  %v485_v60 = vpop.permute.xlu1 %484 }
  0xfb   : > { %2202 = vmatprep.subr.bf16.mxu0 %v2535_v0  ;;  %2220 = vmatprep.subr.bf16.mxu1 %v2535_v0  ;;  %vm667_vm11 = vmor %vm3196_vm5, %vm3203_vm7 }
  0xfc   : > { %2216 = vmatprep.mubr.msk.bf16.mxu0 %vm2536_vm0, %v2535_v0  ;;  %v478_v61 = vpop.permute.xlu0 %477 }
  0xfd   : > { %2197 = vmatmul.mubr.msk.bf16.vlgmr.msra.gmra.mxu1 %vm1952_vm15, %v2537_v27  ;;  %vm1972_vm15 = vmpackc.low %vm666_vm14, %vm666_vm14  ;;  %vm500_vm9 = vcmp.eq.s32.totalorder %v478_v61, %v2997_v16 }
  0xfe   : > { %2203 = vmatpush3.bf16.msra.mxu0 %v2398_v21  ;;  %2221 = vmatpush3.bf16.msra.mxu1 %v2399_v41  ;;  %vm3223_vm12 = vmor %vm366_vm8, %vm500_vm9  ;;  %v2436_v21 = vld [vmem:[%s2649_s0 + $0x218] sm:$0xff]   ;;  %v2437_v41 = vld [vmem:[%s2649_s0 + $0x260] sm:$0xff]  }
  0xff   : > { %2204 = vmatprep.subr.bf16.mxu0 %v2535_v0  ;;  %2222 = vmatprep.subr.bf16.mxu1 %v2535_v0  ;;  %vm668_vm14 = vmor %vm3223_vm12, %vm3215_vm10 }
 0x100   : > { %2236 = vmatprep.mubr.msk.bf16.mxu1 %vm2536_vm0, %v2535_v0  ;;  %v351_v25 = vpop.permute.xlu0 %350 }
 0x101   : > { %vm367_vm2 = vcmp.eq.s32.totalorder %v351_v25, %v2997_v16 }
 0x102   : > { %2205 = vmatpush3.bf16.msra.mxu0 %v2400_v42  ;;  %2223 = vmatpush3.bf16.msra.mxu1 %v2401_v6  ;;  %v358_v42 = vpop.permute.xlu1 %357  ;;  %v2438_v6 = vld [vmem:[%s2649_s0 + $0x210] sm:$0xff]  }
 0x103   : > { %2206 = vmatprep.subr.bf16.mxu0 %v2535_v0  ;;  %2224 = vmatprep.subr.bf16.mxu1 %v2535_v0  ;;  %vm368_vm7 = vcmp.eq.s32.totalorder %v358_v42, %v2997_v16 }
 0x106   : > { %2207 = vmatpush3.bf16.msra.mxu0 %v2402_v11  ;;  %2225 = vmatpush3.bf16.msra.mxu1 %v2403_v14  ;;  %v2439_v11 = vld [vmem:[%s2649_s0 + $0x258] sm:$0xff]   ;;  %v629_v14 = vpop.permute.xlu0 %628 }
 0x107   : > { %2208 = vmatprep.subr.bf16.mxu0 %v2535_v0  ;;  %2226 = vmatprep.subr.bf16.mxu1 %v2535_v0  ;;  %vm645_vm3 = vcmp.eq.s32.totalorder %v629_v14, %v2997_v16 }
 0x108   : > { %vm3275_vm6 = vmand %vm645_vm3, %vm2999_vm1 }
 0x10a   : > { %2209 = vmatpush3.bf16.msra.mxu0 %v2404_v30  ;;  %2227 = vmatpush3.bf16.msra.mxu1 %v2405_v2  ;;  %v636_v30 = vpop.permute.xlu1 %635  ;;  %v492_v2 = vpop.permute.xlu0 %491 }
 0x10b   : > { %2210 = vmatprep.subr.bf16.mxu0 %v2535_v0  ;;  %2228 = vmatprep.subr.bf16.mxu1 %v2535_v0  ;;  %vm646_vm5 = vcmp.eq.s32.totalorder %v636_v30, %v2997_v16  ;;  %vm502_vm8 = vcmp.eq.s32.totalorder %v492_v2, %v2997_v16 }
 0x10c   : > { %vm660_vm9 = vmand %vm646_vm5, %vm2999_vm1 }
 0x10e   : > { %2211 = vmatpush3.bf16.msra.mxu0 %v2406_v5  ;;  %2229 = vmatpush3.bf16.msra.mxu1 %v2407_v26  ;;  %v2442_v26 = vld [vmem:[%s2649_s0 + $0x200] sm:$0xff]  }
 0x10f   : > { %2212 = vmatprep.subr.bf16.mxu0 %v2535_v0  ;;  %2230 = vmatprep.subr.bf16.mxu1 %v2535_v0 }
 0x112   : > { %2213 = vmatpush3.bf16.msra.mxu0 %v2408_v33  ;;  %2231 = vmatpush3.bf16.msra.mxu1 %v2409_v32  ;;  %v2444_v33 = vld [vmem:[%s2649_s0 + $0x240] sm:$0xff]   ;;  %s3419_s0 = sld [smem:[#allocation19_spill]] }
 0x113   : > { %2214 = vmatprep.subr.bf16.mxu0 %v2535_v0  ;;  %2232 = vmatprep.subr.bf16.mxu1 %v2535_v0 }
 0x116   : > { %2215 = vmatpush3.bf16.msra.mxu0 %v2410_v10  ;;  %2233 = vmatpush3.bf16.msra.mxu1 %v2411_v47 }
 0x117   : > { %2234 = vmatprep.subr.bf16.mxu1 %v2535_v0  ;;  %2240 = vmatprep.subr.bf16.mxu0 %v2535_v0 }
 0x118   : > { %s214_s6 = scalar_lea.vmem %s3419_s0, %s3418_s30 }
 0x119   : > { %2217 = vmatmul.mubr.msk.bf16.vlgmr.msra.gmra.mxu0 %vm1962_vm13, %v2537_v27  ;;  %vm1982_vm13 = vmpackc.low %vm667_vm11, %vm667_vm11 }
 0x11a   : > { %2235 = vmatpush3.bf16.msra.mxu1 %v2412_v49  ;;  %2241 = vmatpush3.bf16.msra.mxu0 %v2413_v58  ;;  %vm512_vm11 = vmor %vm368_vm7, %vm502_vm8 }
 0x11b   : > { %2242 = vmatprep.subr.bf16.mxu0 %v2535_v0  ;;  %2260 = vmatprep.subr.bf16.mxu1 %v2535_v0 }
 0x11c   : > { %2256 = vmatprep.mubr.msk.bf16.mxu0 %vm2536_vm0, %v2535_v0 }
 0x11d   : > { %2237 = vmatmul.mubr.msk.bf16.vlgmr.msra.gmra.mxu1 %vm1972_vm15, %v2537_v27  ;;  %vm1992_vm15 = vmpackc.low %vm668_vm14, %vm668_vm14 }
 0x11e   : > { %2243 = vmatpush3.bf16.msra.mxu0 %v2414_v12  ;;  %2261 = vmatpush3.bf16.msra.mxu1 %v2415_v50 }
 0x11f   : > { %2244 = vmatprep.subr.bf16.mxu0 %v2535_v0  ;;  %2262 = vmatprep.subr.bf16.mxu1 %v2535_v0 }
 0x120   : > { %2276 = vmatprep.mubr.msk.bf16.mxu1 %vm2536_vm0, %v2535_v0 }
 0x122   : > { %2245 = vmatpush3.bf16.msra.mxu0 %v2416_v52  ;;  %2263 = vmatpush3.bf16.msra.mxu1 %v2417_v15 }
 0x123   : > { %2246 = vmatprep.subr.bf16.mxu0 %v2535_v0  ;;  %2264 = vmatprep.subr.bf16.mxu1 %v2535_v0 }
 0x126   : > { %2247 = vmatpush3.bf16.msra.mxu0 %v2418_v34  ;;  %2265 = vmatpush3.bf16.msra.mxu1 %v2419_v1 }
 0x127   : > { %2248 = vmatprep.subr.bf16.mxu0 %v2535_v0  ;;  %2266 = vmatprep.subr.bf16.mxu1 %v2535_v0 }
 0x12a   : > { %2249 = vmatpush3.bf16.msra.mxu0 %v2420_v19  ;;  %2267 = vmatpush3.bf16.msra.mxu1 %v2421_v4 }
 0x12b   : > { %2250 = vmatprep.subr.bf16.mxu0 %v2535_v0  ;;  %2268 = vmatprep.subr.bf16.mxu1 %v2535_v0 }
 0x12e   : > { %2251 = vmatpush3.bf16.msra.mxu0 %v2422_v54  ;;  %2269 = vmatpush3.bf16.msra.mxu1 %v2423_v56 }
 0x12f   : > { %2252 = vmatprep.subr.bf16.mxu0 %v2535_v0  ;;  %2270 = vmatprep.subr.bf16.mxu1 %v2535_v0 }
 0x132   : > { %2253 = vmatpush3.bf16.msra.mxu0 %v2424_v39  ;;  %2271 = vmatpush3.bf16.msra.mxu1 %v2425_v43 }
 0x133   : > { %2254 = vmatprep.subr.bf16.mxu0 %v2535_v0  ;;  %2272 = vmatprep.subr.bf16.mxu1 %v2535_v0 }
 0x136   : > { %2255 = vmatpush3.bf16.msra.mxu0 %v2426_v7  ;;  %2273 = vmatpush3.bf16.msra.mxu1 %v2427_v37 }
 0x137   : > { %2274 = vmatprep.subr.bf16.mxu1 %v2535_v0  ;;  %2280 = vmatprep.subr.bf16.mxu0 %v2535_v0 }
 0x139   : > { %2257 = vmatmul.mubr.msk.bf16.vlgmr.msra.gmra.mxu0 %vm1982_vm13, %v2537_v27  ;;  %vm670_vm13 = vmor %vm512_vm11, %vm660_vm9 }
 0x13a   : > { %2275 = vmatpush3.bf16.msra.mxu1 %v2428_v44  ;;  %2281 = vmatpush3.bf16.msra.mxu0 %v2429_v46  ;;  %vm2012_vm14 = vmpackc.low %vm670_vm13, %vm670_vm13 }
 0x13b   : > { %2282 = vmatprep.subr.bf16.mxu0 %v2535_v0  ;;  %2300 = vmatprep.subr.bf16.mxu1 %v2535_v0 }
 0x13c   : > { %2296 = vmatprep.mubr.msk.bf16.mxu0 %vm2536_vm0, %v2535_v0 }
 0x13d   : > { %2277 = vmatmul.mubr.msk.bf16.vlgmr.msra.gmra.mxu1 %vm1992_vm15, %v2537_v27  ;;  %vm1772_vm15 = vcmask 80896  }
 0x13e   : > { %2283 = vmatpush3.bf16.msra.mxu0 %v2430_v51  ;;  %2301 = vmatpush3.bf16.msra.mxu1 %v2431_v53 }
 0x13f   : > { %2284 = vmatprep.subr.bf16.mxu0 %v2535_v0  ;;  %2302 = vmatprep.subr.bf16.mxu1 %v2535_v0 }
 0x140   : > { %2316 = vmatprep.mubr.msk.bf16.mxu1 %vm2536_vm0, %v2535_v0  ;;  %vm501_vm0 = vcmp.eq.s32.totalorder %v485_v60, %v2997_v16 }
 0x141   : > { %vm3268_vm4 = vmor %vm367_vm2, %vm501_vm0 }
 0x142   : > { %2285 = vmatpush3.bf16.msra.mxu0 %v2432_v13  ;;  %2303 = vmatpush3.bf16.msra.mxu1 %v2433_v18  ;;  %vm669_vm10 = vmor %vm3268_vm4, %vm3275_vm6 }
 0x143   : > { %2286 = vmatprep.subr.bf16.mxu0 %v2535_v0  ;;  %2304 = vmatprep.subr.bf16.mxu1 %v2535_v0  ;;  %vm2002_vm12 = vmpackc.low %vm669_vm10, %vm669_vm10 }
 0x146   : > { %2287 = vmatpush3.bf16.msra.mxu0 %v2434_v57  ;;  %2305 = vmatpush3.bf16.msra.mxu1 %v2435_v22 }
 0x147   : > { %2288 = vmatprep.subr.bf16.mxu0 %v2535_v0  ;;  %2306 = vmatprep.subr.bf16.mxu1 %v2535_v0 }
 0x14a   : > { %2289 = vmatpush3.bf16.msra.mxu0 %v2436_v21  ;;  %2307 = vmatpush3.bf16.msra.mxu1 %v2437_v41 }
 0x14b   : > { %2290 = vmatprep.subr.bf16.mxu0 %v2535_v0  ;;  %2308 = vmatprep.subr.bf16.mxu1 %v2535_v0 }
 0x14e   : > { %2291 = vmatpush3.bf16.msra.mxu0 %v2438_v6  ;;  %2309 = vmatpush3.bf16.msra.mxu1 %v2439_v11 }
 0x14f   : > { %2292 = vmatprep.subr.bf16.mxu0 %v2535_v0  ;;  %2310 = vmatprep.subr.bf16.mxu1 %v2535_v0 }
 0x152   : > { %2293 = vmatpush3.bf16.msra.mxu0 %v2440_v20  ;;  %2311 = vmatpush3.bf16.msra.mxu1 %v2441_v29 }
 0x153   : > { %2294 = vmatprep.subr.bf16.mxu0 %v2535_v0  ;;  %2312 = vmatprep.subr.bf16.mxu1 %v2535_v0 }
 0x156   : > { %2295 = vmatpush3.bf16.msra.mxu0 %v2442_v26  ;;  %2313 = vmatpush3.bf16.msra.mxu1 %v2443_v28 }
 0x157   : > { %2314 = vmatprep.subr.bf16.mxu1 %v2535_v0 }
 0x159   : > { %2297 = vmatmul.mubr.msk.bf16.vlgmr.msra.gmra.mxu0 %vm2002_vm12, %v2537_v27 }
 0x15a   : > { %2315 = vmatpush3.bf16.msra.mxu1 %v2444_v33 }
 0x15d   : > { %2317 = vmatmul.mubr.msk.bf16.vlgmr.msra.gmra.mxu1 %vm2012_vm14, %v2537_v27 }
 0x199   : > { %v943_v16 = vpop.f32.mrf.mxu0 }
 0x19a   : > { %vm1741_vm1 = vcmp.ge.f32.partialorder %v943_v16, 0.5 }
 0x19b   : > { %v2138_v17 = vpop.f32.mrf.mxu0  ;;  %v2014_v32 = vsel %vm1741_vm1, 1.0, %v2535_v0 }
 0x19c   : > { %v1773_v47 = vsel %vm1772_vm15, %v2014_v32, 0.0 }
 0x19d   : > { %v946_v36 = vpop.f32.mrf.mxu0  ;;  %v1031_v38 = vpop.f32.mrf.mxu1 }
 0x19e   : > { %vm1742_vm0 = vcmp.ge.f32.partialorder %v1031_v38, 0.5 }
 0x19f   : > { %v2015_v9 = vsel %vm1742_vm0, 1.0, %v2535_v0  ;;  %v2139_v45 = vpop.f32.mrf.mxu0  ;;  %v2158_v10 = vpop.f32.mrf.mxu1 }
 0x1a0   : > { %v1774_v55 = vsel %vm1772_vm15, %v2015_v9, 0.0  ;;  %v2024_v9 = vld [vmem:[%s214_s6] ss:$0 sm:$0xff] }
 0x1a1   : > { %v1775_v48 = vadd.f32 %v1774_v55, %v1773_v47  ;;  %v1034_v49 = vpop.f32.mrf.mxu1 }
 0x1a3   : > { %v2159_v27 = vpop.f32.mrf.mxu1 }
 0x1b9   : > { %v1119_v58 = vpop.f32.mrf.mxu0 }
 0x1ba   : > { %vm1743_vm2 = vcmp.ge.f32.partialorder %v1119_v58, 0.5 }
 0x1bb   : > { %v2016_v12 = vsel %vm1743_vm2, 1.0, %v2535_v0  ;;  %v2178_v50 = vpop.f32.mrf.mxu0 }
 0x1bc   : > { %v1776_v52 = vsel %vm1772_vm15, %v2016_v12, 0.0 }
 0x1bd   : > { %v1777_v15 = vadd.f32 %v1776_v52, %v1775_v48  ;;  %v1122_v34 = vpop.f32.mrf.mxu0  ;;  %v1207_v1 = vpop.f32.mrf.mxu1 }
 0x1be   : > { %vm1744_vm3 = vcmp.ge.f32.partialorder %v1207_v1, 0.5 }
 0x1bf   : > { %v2017_v31 = vsel %vm1744_vm3, 1.0, %v2535_v0  ;;  %v2179_v23 = vpop.f32.mrf.mxu0  ;;  %v2198_v19 = vpop.f32.mrf.mxu1 }
 0x1c0   : > { %v1778_v4 = vsel %vm1772_vm15, %v2017_v31, 0.0 }
 0x1c1   : > { %v1779_v35 = vadd.f32 %v1778_v4, %v1777_v15  ;;  %v1210_v54 = vpop.f32.mrf.mxu1 }
 0x1c3   : > { %v2199_v56 = vpop.f32.mrf.mxu1 }
 0x1d9   : > { %v1295_v59 = vpop.f32.mrf.mxu0 }
 0x1da   : > { %vm1745_vm4 = vcmp.ge.f32.partialorder %v1295_v59, 0.5 }
 0x1db   : > { %v2218_v39 = vpop.f32.mrf.mxu0  ;;  %v2018_v18 = vsel %vm1745_vm4, 1.0, %v2535_v0 }
 0x1dc   : > { %v1780_v22 = vsel %vm1772_vm15, %v2018_v18, 0.0 }
 0x1dd   : > { %v1298_v43 = vpop.f32.mrf.mxu0  ;;  %v1383_v3 = vpop.f32.mrf.mxu1  ;;  %v1781_v21 = vadd.f32 %v1780_v22, %v1779_v35 }
 0x1de   : > { %vm1746_vm5 = vcmp.ge.f32.partialorder %v1383_v3, 0.5 }
 0x1df   : > { %v2219_v61 = vpop.f32.mrf.mxu0  ;;  %v2238_v62 = vpop.f32.mrf.mxu1  ;;  %v2019_v57 = vsel %vm1746_vm5, 1.0, %v2535_v0 }
 0x1e0   : > { %v1782_v25 = vsel %vm1772_vm15, %v2019_v57, 0.0 }
 0x1e1   : > { %v1386_v63 = vpop.f32.mrf.mxu1  ;;  %v1783_v6 = vadd.f32 %v1782_v25, %v1781_v21 }
 0x1e3   : > { %v2239_v7 = vpop.f32.mrf.mxu1 }
 0x1f9   : > { %v1471_v37 = vpop.f32.mrf.mxu0 }
 0x1fa   : > { %vm1747_vm6 = vcmp.ge.f32.partialorder %v1471_v37, 0.5 }
 0x1fb   : > { %v2258_v40 = vpop.f32.mrf.mxu0  ;;  %v2020_v60 = vsel %vm1747_vm6, 1.0, %v2535_v0 }
 0x1fc   : > { %v1784_v42 = vsel %vm1772_vm15, %v2020_v60, 0.0 }
 0x1fd   : > { %v1474_v8 = vpop.f32.mrf.mxu0  ;;  %v1559_v44 = vpop.f32.mrf.mxu1  ;;  %v1785_v20 = vadd.f32 %v1784_v42, %v1783_v6 }
 0x1fe   : > { %vm1748_vm7 = vcmp.ge.f32.partialorder %v1559_v44, 0.5 }
 0x1ff   : > { %v2259_v46 = vpop.f32.mrf.mxu0  ;;  %v2278_v51 = vpop.f32.mrf.mxu1  ;;  %v2021_v41 = vsel %vm1748_vm7, 1.0, %v2535_v0 }
 0x200   : > { %v1786_v14 = vsel %vm1772_vm15, %v2021_v41, 0.0 }
 0x201   : > { %v1562_v53 = vpop.f32.mrf.mxu1  ;;  %v1787_v24 = vadd.f32 %v1786_v14, %v1785_v20 }
 0x203   : > { %v2279_v13 = vpop.f32.mrf.mxu1 }
 0x219   : > { %v1647_v11 = vpop.f32.mrf.mxu0 }
 0x21a   : > { %vm1749_vm8 = vcmp.ge.f32.partialorder %v1647_v11, 0.5 }
 0x21b   : > { %v2022_v29 = vsel %vm1749_vm8, 1.0, %v2535_v0  ;;  %v2298_v30 = vpop.f32.mrf.mxu0 }
 0x21c   : > { %v1788_v2 = vsel %vm1772_vm15, %v2022_v29, 0.0 }
 0x21d   : > { %v1650_v5 = vpop.f32.mrf.mxu0  ;;  %v1735_v26 = vpop.f32.mrf.mxu1  ;;  %v1789_v28 = vadd.f32 %v1788_v2, %v1787_v24 }
 0x21e   : > { %vm1750_vm9 = vcmp.ge.f32.partialorder %v1735_v26, 0.5 }
 0x21f   : > { %v2023_v33 = vsel %vm1750_vm9, 1.0, %v2535_v0  ;;  %v2299_v16 = vpop.f32.mrf.mxu0  ;;  %v2318_v17 = vpop.f32.mrf.mxu1 }
 0x220   : > { %v1790_v32 = vsel %vm1772_vm15, %v2023_v33, 0.0 }
 0x221   : > { %v1791_v36 = vadd.f32 %v1790_v32, %v1789_v28  ;;  %v1738_v38 = vpop.f32.mrf.mxu1 }
 0x223   : > { %v1792_v45 = vmul.f32 2.0, %v1791_v36  ;;  %v2319_v10 = vpop.f32.mrf.mxu1 }
 0x225   : > { %v1799_v47 = vsub.f32 %v2024_v9, %v1792_v45 }
 0x227   : > { %1800 = vst.msk [vmem:[%s201_s18] sm:$0xff] %vm1772_vm15, %v1799_v47 }
 0x228   : > { %2482 = shalt.err (!%p2479_p0)
}
 0x229   : > { %s2483_s10 = scalar_lea.hbm %s1813_s19, 128  ;;  %s2487_s7 = scalar_lea.hbm %s3421_s9, 256 }
 0x22a   : > { %p2484_p3 = scmp.ne.s32.totalorder %s1813_s19, %s2483_s10  ;;  %p2488_p6 = scmp.lt.s32.totalorder %s1813_s19, %s3421_s9 }
 0x22b   : > { %p2489_p7 = scmp.lt.s32.totalorder %s2487_s7, %s2483_s10 }
 0x22c   : > { %p2485_p4 = pnand %p2484_p3, %p2613_p1 }
 0x22d   : > { %p2490_p8 = por %p2489_p7, %p2488_p6 }
 0x22e   : > { %p2486_p5 = pneg %p2485_p4 }
 0x230   : > { %p2491_p9 = pnand %p2490_p8, %p2486_p5 }
 0x232   : > { %2494 = shalt.err (!%p2491_p9)
}
 0x233   : > { %2321 = dma.vmem_to_hbm [thread:$0]  (%p2613_p1), %s1816_s20, 128, %s1813_s19, %s1802_s25  }
 0x234 PF: > { %s3422_s29 = sld [smem:[#allocation11_spill]] }
 0x235   : > { %s3423_s5 = sld [smem:[#allocation9_spill]] }
 0x23a   : > { %p2327_p10 = scmp.ge.s32.totalorder %s3422_s29, 2 }
 0x23b   : > { %s1827_s2 = sand.u32 1, %s3423_s5  }
 0x23c   : > { %p2324_p11 = pnand %p2327_p10, %p2617_p2  ;;  %s1828_s4 = scalar_lea.sflag [#allocation6], %s1827_s2 }
 0x23e   : > { %p2325_p12 = pneg %p2324_p11 }
 0x240   : > { %2514 = dma.done.wait (%p2325_p12), %s1828_s4, 128  }
 0x241   : > { %2516 = vsyncadd (%p2325_p12), %s1828_s4, 4294967168  ;;  %s3425_s29 = sld [smem:[#allocation12_spill]]  ;;  %s3428_s1 = smov %s2523_s27 }
 0x242   : > { %s3426_s30 = sld [smem:[#allocation10_spill]] }
 0x243   : > { %s3427_s28 = sld [smem:[#allocation13_spill]] }
 0x247   : > { %p25_p13 = scmp.ge.s32.totalorder %s3425_s29, 4  }
 0x248   : > { %s3429_s27 = smov %s3426_s30 }
 0x249   :  { %27 = sbr.rel (!%p25_p13) target bundleno = 30 (0x1e), region = 73 }
 0x24e   :  { %1833 = vsyncpa [#allocation6], 1 }
 0x24f   :  { %1835 = vsyncpa [#allocation6 + $0x1], 1 }

</bundles_post_ra>
